<compile_context>
chip_gen: v5e
topology: v5e:2x2
jax: 0.10.0
libtpu: 0.0.40
codegen_flags: <defaults>
</compile_context>

<pallas_src>
import functools

import jax
import jax.numpy as jnp
from jax import lax
from jax.experimental import pallas as pl
from jax.experimental.pallas import tpu as pltpu


def bilstm_fc_kernel(sel_step_ref, x_ref,
                     wih_ref, whh_ref, b_ref,
                     wfc_ref, bfc_ref,
                     out_ref,
                     xproj_scr,
                     *, T, Bp, H):
    # ---- hoisted input projection (both directions, all timesteps) --------
    # x_ref: (T*Bp, I), wih_ref: (I, 8H) = [Wih_f^T | Wih_b^T]
    # columns [0, 4H) are forward gates, [4H, 8H) backward gates.
    xproj_scr[...] = (jnp.dot(x_ref[...], wih_ref[...],
                              preferred_element_type=jnp.float32)
                      + b_ref[...])

    sel_step = sel_step_ref[...]                       # (2Bp, 1) int32
    zeros = jnp.zeros((2 * Bp, H), jnp.float32)

    def step(s, carry):
        h, c, sel = carry                              # each (2Bp, H)
        row_f = pl.multiple_of(s * Bp, Bp)             # forward time  = s
        row_b = pl.multiple_of((T - 1 - s) * Bp, Bp)   # backward time = T-1-s
        xf = xproj_scr[pl.ds(row_f, Bp), 0:4 * H]      # (Bp, 4H)
        xb = xproj_scr[pl.ds(row_b, Bp), 4 * H:8 * H]  # (Bp, 4H)

        # One stacked recurrent matmul for both directions:
        # [h_f; h_b] (2Bp, H) @ [Whh_f^T | Whh_b^T] (H, 8H)
        g_all = jnp.dot(h, whh_ref[...],
                        preferred_element_type=jnp.float32)        # (2Bp, 8H)
        gates = jnp.concatenate([g_all[:Bp, 0:4 * H] + xf,
                                 g_all[Bp:, 4 * H:8 * H] + xb],
                                axis=0)                             # (2Bp, 4H)

        i_g = jax.nn.sigmoid(gates[:, 0 * H:1 * H])
        f_g = jax.nn.sigmoid(gates[:, 1 * H:2 * H])
        g_g = jnp.tanh(gates[:, 2 * H:3 * H])
        o_g = jax.nn.sigmoid(gates[:, 3 * H:4 * H])
        c_new = f_g * c + i_g * g_g
        h_new = o_g * jnp.tanh(c_new)

        # In-loop last-valid-timestep selection (replaces (T,B,H) scratch +
        # one-hot gather). Forward rows fire at s == seq_len-1, backward rows
        # at s == T - seq_len; both encoded in sel_step by the wrapper.
        sel_new = jnp.where(sel_step == s, h_new, sel)
        return h_new, c_new, sel_new

    _, _, sel = lax.fori_loop(0, T, step, (zeros, zeros, zeros), unroll=True)

    # Final FC: concat(fwd, bwd) (Bp, 2H) @ (2H, O) + bias.
    feat = jnp.concatenate([sel[:Bp], sel[Bp:]], axis=1)            # (Bp, 2H)
    out_ref[...] = (jnp.dot(feat, wfc_ref[...],
                            preferred_element_type=jnp.float32)
                    + bfc_ref[...])


def fancy_model_forward(x, seq_lens, params):
    """x: (B, T, I) batch-first float32, seq_lens: (B,) int32."""
    B, T, I = x.shape
    H = params["whh_f"].shape[1]
    O = params["wfc"].shape[0]

    # Pad batch up to a full sublane group so state/gate tiles are dense.
    Bp = max(8, ((B + 7) // 8) * 8)

    x_tm = jnp.transpose(x, (1, 0, 2)).astype(jnp.float32)          # (T, B, I)
    if Bp != B:
        x_tm = jnp.pad(x_tm, ((0, 0), (0, Bp - B), (0, 0)))
    x2d = x_tm.reshape(T * Bp, I)                                   # (T*Bp, I)

    seq = seq_lens.astype(jnp.int32)
    if Bp != B:
        seq = jnp.pad(seq, (0, Bp - B), constant_values=1)
    # Step at which each (direction, row) produces its last-valid hidden.
    sel_step = jnp.concatenate([seq - 1, T - seq]).reshape(2 * Bp, 1)

    wih = jnp.concatenate([params["wih_f"].T, params["wih_b"].T], axis=1)  # (I, 8H)
    whh = jnp.concatenate([params["whh_f"].T, params["whh_b"].T], axis=1)  # (H, 8H)
    b = jnp.concatenate([params["bih_f"] + params["bhh_f"],
                         params["bih_b"] + params["bhh_b"]]).reshape(1, 8 * H)
    wfc = params["wfc"].T                                                   # (2H, O)
    bfc = params["bfc"].reshape(1, O)

    vmem = pl.BlockSpec(memory_space=pltpu.MemorySpace.VMEM)
    kernel = functools.partial(bilstm_fc_kernel, T=T, Bp=Bp, H=H)
    out = pl.pallas_call(
        kernel,
        out_shape=jax.ShapeDtypeStruct((Bp, O), jnp.float32),
        in_specs=[vmem] * 7,
        out_specs=vmem,
        scratch_shapes=[
            pltpu.VMEM((T * Bp, 8 * H), jnp.float32),   # hoisted input proj
        ],
    )(sel_step, x2d, wih, whh, b, wfc, bfc)
    return out[:B]


def reference_forward(x, seq_lens, params):
    """Pure-JAX reference matching PyTorch nn.LSTM(bidirectional) semantics."""
    B, T, I = x.shape
    H = params["whh_f"].shape[1]

    def run_dir(wih, whh, bih, bhh, xs):
        def step(carry, x_t):
            h, c = carry
            gates = x_t @ wih.T + h @ whh.T + bih + bhh
            i, f, g, o = jnp.split(gates, 4, axis=-1)
            i = jax.nn.sigmoid(i)
            f = jax.nn.sigmoid(f)
            g = jnp.tanh(g)
            o = jax.nn.sigmoid(o)
            c = f * c + i * g
            h = o * jnp.tanh(c)
            return (h, c), h
        init = (jnp.zeros((B, H), jnp.float32), jnp.zeros((B, H), jnp.float32))
        _, hs = lax.scan(step, init, xs)
        return hs                                                    # (T, B, H)

    xs = jnp.transpose(x, (1, 0, 2))
    hf = run_dir(params["wih_f"], params["whh_f"],
                 params["bih_f"], params["bhh_f"], xs)
    hb = run_dir(params["wih_b"], params["whh_b"],
                 params["bih_b"], params["bhh_b"], xs[::-1])[::-1]
    out_full = jnp.concatenate([hf, hb], axis=-1)                    # (T, B, 2H)
    sel = out_full[seq_lens - 1, jnp.arange(B)]                      # (B, 2H)
    return sel @ params["wfc"].T + params["bfc"]


def init_params(key, inp, hid, out):
    ks = jax.random.split(key, 10)
    k_lstm = 1.0 / jnp.sqrt(hid)
    k_fc = 1.0 / jnp.sqrt(2 * hid)
    u = lambda k, shape, b: jax.random.uniform(k, shape, jnp.float32, -b, b)
    return {
        "wih_f": u(ks[0], (4 * hid, inp), k_lstm),
        "whh_f": u(ks[1], (4 * hid, hid), k_lstm),
        "bih_f": u(ks[2], (4 * hid,), k_lstm),
        "bhh_f": u(ks[3], (4 * hid,), k_lstm),
        "wih_b": u(ks[4], (4 * hid, inp), k_lstm),
        "whh_b": u(ks[5], (4 * hid, hid), k_lstm),
        "bih_b": u(ks[6], (4 * hid,), k_lstm),
        "bhh_b": u(ks[7], (4 * hid,), k_lstm),
        "wfc":   u(ks[8], (out, 2 * hid), k_fc),
        "bfc":   u(ks[9], (out,), k_fc),
    }


if __name__ == "__main__":
    B, T, I, H, O = 2, 8, 16, 32, 8

    key = jax.random.PRNGKey(0)
    k_x, k_p = jax.random.split(key)
    x = jax.random.normal(k_x, (B, T, I), jnp.float32)
    seq_lens = jnp.array([5, 8], dtype=jnp.int32)
    params = init_params(k_p, I, H, O)

    out = fancy_model_forward(x, seq_lens, params)
    out = jax.block_until_ready(out)

    ref = reference_forward(x, seq_lens, params)
    assert out.shape == (B, O)
    assert jnp.allclose(out, ref, rtol=1e-3, atol=1e-3), (out, ref)

    print("KERNEL_OK")
</pallas_src>

<mosaic_0001>
module attributes {stable_mosaic.version = 11 : i64} {
  func.func @bilstm_fc_kernel(%arg0: memref<16x1xi32, #tpu.memory_space<vmem>>, %arg1: memref<64x16xf32, #tpu.memory_space<vmem>>, %arg2: memref<16x256xf32, #tpu.memory_space<vmem>>, %arg3: memref<32x256xf32, #tpu.memory_space<vmem>>, %arg4: memref<1x256xf32, #tpu.memory_space<vmem>>, %arg5: memref<64x8xf32, #tpu.memory_space<vmem>>, %arg6: memref<1x8xf32, #tpu.memory_space<vmem>>, %arg7: memref<8x8xf32, #tpu.memory_space<vmem>>, %arg8: memref<64x256xf32, #tpu.memory_space<vmem>>) attributes {dimension_semantics = [], scalar_prefetch = 0 : i64, scratch_operands = 1 : i64, tpu.core_type = #tpu.core_type<tc>} {
    %c0 = arith.constant 0 : index
    %c0_0 = arith.constant 0 : index
    %0 = vector.load %arg1[%c0, %c0_0] : memref<64x16xf32, #tpu.memory_space<vmem>>, vector<64x16xf32>
    %c0_1 = arith.constant 0 : index
    %c0_2 = arith.constant 0 : index
    %1 = vector.load %arg2[%c0_1, %c0_2] : memref<16x256xf32, #tpu.memory_space<vmem>>, vector<16x256xf32>
    %cst = arith.constant dense<0.000000e+00> : vector<64x256xf32>
    %2 = tpu.matmul %0, %1, %cst {dimension_numbers = #tpu.dot_dimension_numbers<[1], [0], [0], [1], [0, 0, 1, 1], [], []>} : vector<64x16xf32>, vector<16x256xf32>, vector<64x256xf32> -> vector<64x256xf32>
    %c0_3 = arith.constant 0 : index
    %c0_4 = arith.constant 0 : index
    %3 = vector.load %arg4[%c0_3, %c0_4] : memref<1x256xf32, #tpu.memory_space<vmem>>, vector<1x256xf32>
    %4 = vector.broadcast %3 : vector<1x256xf32> to vector<64x256xf32>
    %5 = arith.addf %2, %4 : vector<64x256xf32>
    %c0_5 = arith.constant 0 : index
    %c0_6 = arith.constant 0 : index
    %6 = vector.load %arg8[%c0_5, %c0_6] : memref<64x256xf32, #tpu.memory_space<vmem>>, vector<64x256xf32>
    tpu.vector_store %arg8[%c0_5, %c0_6], %5 {strides = array<i32>} : memref<64x256xf32, #tpu.memory_space<vmem>>, vector<64x256xf32>,
    %c0_7 = arith.constant 0 : index
    %c0_8 = arith.constant 0 : index
    %7 = vector.load %arg0[%c0_7, %c0_8] : memref<16x1xi32, #tpu.memory_space<vmem>>, vector<16x1xi32>
    %cst_9 = arith.constant 0.000000e+00 : f32
    %8 = vector.broadcast %cst_9 : f32 to vector<16x32xf32>
    %c0_i32 = arith.constant 0 : i32
    %c8_i32 = arith.constant 8 : i32
    %9 = arith.muli %c0_i32, %c8_i32 : i32
    %10 = tpu.assume_multiple %9, 8 : i32
    %c7_i32 = arith.constant 7 : i32
    %11 = arith.subi %c7_i32, %c0_i32 : i32
    %c8_i32_10 = arith.constant 8 : i32
    %12 = arith.muli %11, %c8_i32_10 : i32
    %13 = tpu.assume_multiple %12, 8 : i32
    %14 = arith.index_cast %10 : i32 to index
    %c0_11 = arith.constant 0 : index
    %15 = vector.load %arg8[%14, %c0_11] : memref<64x256xf32, #tpu.memory_space<vmem>>, vector<8x128xf32>
    %16 = arith.index_cast %13 : i32 to index
    %c128 = arith.constant 128 : index
    %17 = vector.load %arg8[%16, %c128] : memref<64x256xf32, #tpu.memory_space<vmem>>, vector<8x128xf32>
    %c0_12 = arith.constant 0 : index
    %c0_13 = arith.constant 0 : index
    %18 = vector.load %arg3[%c0_12, %c0_13] : memref<32x256xf32, #tpu.memory_space<vmem>>, vector<32x256xf32>
    %cst_14 = arith.constant dense<0.000000e+00> : vector<16x256xf32>
    %19 = tpu.matmul %8, %18, %cst_14 {dimension_numbers = #tpu.dot_dimension_numbers<[1], [0], [0], [1], [0, 0, 1, 1], [], []>} : vector<16x32xf32>, vector<32x256xf32>, vector<16x256xf32> -> vector<16x256xf32>
    %20 = vector.extract_strided_slice %19 {offsets = [0, 0], sizes = [8, 128], strides = [1, 1]} : vector<16x256xf32> to vector<8x128xf32>
    %21 = arith.addf %20, %15 : vector<8x128xf32>
    %22 = vector.extract_strided_slice %19 {offsets = [8, 128], sizes = [8, 128], strides = [1, 1]} : vector<16x256xf32> to vector<8x128xf32>
    %23 = arith.addf %22, %17 : vector<8x128xf32>
    %24 = tpu.concatenate %21, %23 in 0 : vector<8x128xf32>, vector<8x128xf32> -> vector<16x128xf32>
    %25 = vector.extract_strided_slice %24 {offsets = [0, 0], sizes = [16, 32], strides = [1, 1]} : vector<16x128xf32> to vector<16x32xf32>
    %26 = arith.negf %25 : vector<16x32xf32>
    %27 = math.exp %26 : vector<16x32xf32>
    %cst_15 = arith.constant 1.000000e+00 : f32
    %28 = vector.broadcast %cst_15 : f32 to vector<16x32xf32>
    %29 = arith.addf %28, %27 : vector<16x32xf32>
    %30 = arith.divf %28, %29 : vector<16x32xf32>
    %31 = vector.extract_strided_slice %24 {offsets = [0, 32], sizes = [16, 32], strides = [1, 1]} : vector<16x128xf32> to vector<16x32xf32>
    %32 = arith.negf %31 : vector<16x32xf32>
    %33 = math.exp %32 : vector<16x32xf32>
    %cst_16 = arith.constant 1.000000e+00 : f32
    %34 = vector.broadcast %cst_16 : f32 to vector<16x32xf32>
    %35 = arith.addf %34, %33 : vector<16x32xf32>
    %36 = arith.divf %34, %35 : vector<16x32xf32>
    %37 = vector.extract_strided_slice %24 {offsets = [0, 64], sizes = [16, 32], strides = [1, 1]} : vector<16x128xf32> to vector<16x32xf32>
    %38 = math.tanh %37 : vector<16x32xf32>
    %39 = vector.extract_strided_slice %24 {offsets = [0, 96], sizes = [16, 32], strides = [1, 1]} : vector<16x128xf32> to vector<16x32xf32>
    %40 = arith.negf %39 : vector<16x32xf32>
    %41 = math.exp %40 : vector<16x32xf32>
    %cst_17 = arith.constant 1.000000e+00 : f32
    %42 = vector.broadcast %cst_17 : f32 to vector<16x32xf32>
    %43 = arith.addf %42, %41 : vector<16x32xf32>
    %44 = arith.divf %42, %43 : vector<16x32xf32>
    %45 = arith.mulf %36, %8 : vector<16x32xf32>
    %46 = arith.mulf %30, %38 : vector<16x32xf32>
    %47 = arith.addf %45, %46 : vector<16x32xf32>
    %48 = math.tanh %47 : vector<16x32xf32>
    %49 = arith.mulf %44, %48 : vector<16x32xf32>
    %50 = vector.broadcast %c0_i32 : i32 to vector<16x1xi32>
    %51 = arith.cmpi eq, %7, %50 : vector<16x1xi32>
    %52 = vector.shape_cast %51 : vector<16x1xi1> to vector<16x1xi1>
    %53 = vector.broadcast %52 : vector<16x1xi1> to vector<16x32xi1>
    %54 = arith.select %53, %49, %8 : vector<16x32xi1>, vector<16x32xf32>
    %c1_i32 = arith.constant 1 : i32
    %c8_i32_18 = arith.constant 8 : i32
    %55 = arith.muli %c1_i32, %c8_i32_18 : i32
    %56 = tpu.assume_multiple %55, 8 : i32
    %c7_i32_19 = arith.constant 7 : i32
    %57 = arith.subi %c7_i32_19, %c1_i32 : i32
    %c8_i32_20 = arith.constant 8 : i32
    %58 = arith.muli %57, %c8_i32_20 : i32
    %59 = tpu.assume_multiple %58, 8 : i32
    %60 = arith.index_cast %56 : i32 to index
    %c0_21 = arith.constant 0 : index
    %61 = vector.load %arg8[%60, %c0_21] : memref<64x256xf32, #tpu.memory_space<vmem>>, vector<8x128xf32>
    %62 = arith.index_cast %59 : i32 to index
    %c128_22 = arith.constant 128 : index
    %63 = vector.load %arg8[%62, %c128_22] : memref<64x256xf32, #tpu.memory_space<vmem>>, vector<8x128xf32>
    %c0_23 = arith.constant 0 : index
    %c0_24 = arith.constant 0 : index
    %64 = vector.load %arg3[%c0_23, %c0_24] : memref<32x256xf32, #tpu.memory_space<vmem>>, vector<32x256xf32>
    %cst_25 = arith.constant dense<0.000000e+00> : vector<16x256xf32>
    %65 = tpu.matmul %49, %64, %cst_25 {dimension_numbers = #tpu.dot_dimension_numbers<[1], [0], [0], [1], [0, 0, 1, 1], [], []>} : vector<16x32xf32>, vector<32x256xf32>, vector<16x256xf32> -> vector<16x256xf32>
    %66 = vector.extract_strided_slice %65 {offsets = [0, 0], sizes = [8, 128], strides = [1, 1]} : vector<16x256xf32> to vector<8x128xf32>
    %67 = arith.addf %66, %61 : vector<8x128xf32>
    %68 = vector.extract_strided_slice %65 {offsets = [8, 128], sizes = [8, 128], strides = [1, 1]} : vector<16x256xf32> to vector<8x128xf32>
    %69 = arith.addf %68, %63 : vector<8x128xf32>
    %70 = tpu.concatenate %67, %69 in 0 : vector<8x128xf32>, vector<8x128xf32> -> vector<16x128xf32>
    %71 = vector.extract_strided_slice %70 {offsets = [0, 0], sizes = [16, 32], strides = [1, 1]} : vector<16x128xf32> to vector<16x32xf32>
    %72 = arith.negf %71 : vector<16x32xf32>
    %73 = math.exp %72 : vector<16x32xf32>
    %cst_26 = arith.constant 1.000000e+00 : f32
    %74 = vector.broadcast %cst_26 : f32 to vector<16x32xf32>
    %75 = arith.addf %74, %73 : vector<16x32xf32>
    %76 = arith.divf %74, %75 : vector<16x32xf32>
    %77 = vector.extract_strided_slice %70 {offsets = [0, 32], sizes = [16, 32], strides = [1, 1]} : vector<16x128xf32> to vector<16x32xf32>
    %78 = arith.negf %77 : vector<16x32xf32>
    %79 = math.exp %78 : vector<16x32xf32>
    %cst_27 = arith.constant 1.000000e+00 : f32
    %80 = vector.broadcast %cst_27 : f32 to vector<16x32xf32>
    %81 = arith.addf %80, %79 : vector<16x32xf32>
    %82 = arith.divf %80, %81 : vector<16x32xf32>
    %83 = vector.extract_strided_slice %70 {offsets = [0, 64], sizes = [16, 32], strides = [1, 1]} : vector<16x128xf32> to vector<16x32xf32>
    %84 = math.tanh %83 : vector<16x32xf32>
    %85 = vector.extract_strided_slice %70 {offsets = [0, 96], sizes = [16, 32], strides = [1, 1]} : vector<16x128xf32> to vector<16x32xf32>
    %86 = arith.negf %85 : vector<16x32xf32>
    %87 = math.exp %86 : vector<16x32xf32>
    %cst_28 = arith.constant 1.000000e+00 : f32
    %88 = vector.broadcast %cst_28 : f32 to vector<16x32xf32>
    %89 = arith.addf %88, %87 : vector<16x32xf32>
    %90 = arith.divf %88, %89 : vector<16x32xf32>
    %91 = arith.mulf %82, %47 : vector<16x32xf32>
    %92 = arith.mulf %76, %84 : vector<16x32xf32>
    %93 = arith.addf %91, %92 : vector<16x32xf32>
    %94 = math.tanh %93 : vector<16x32xf32>
    %95 = arith.mulf %90, %94 : vector<16x32xf32>
    %96 = vector.broadcast %c1_i32 : i32 to vector<16x1xi32>
    %97 = arith.cmpi eq, %7, %96 : vector<16x1xi32>
    %98 = vector.shape_cast %97 : vector<16x1xi1> to vector<16x1xi1>
    %99 = vector.broadcast %98 : vector<16x1xi1> to vector<16x32xi1>
    %100 = arith.select %99, %95, %54 : vector<16x32xi1>, vector<16x32xf32>
    %c2_i32 = arith.constant 2 : i32
    %c8_i32_29 = arith.constant 8 : i32
    %101 = arith.muli %c2_i32, %c8_i32_29 : i32
    %102 = tpu.assume_multiple %101, 8 : i32
    %c7_i32_30 = arith.constant 7 : i32
    %103 = arith.subi %c7_i32_30, %c2_i32 : i32
    %c8_i32_31 = arith.constant 8 : i32
    %104 = arith.muli %103, %c8_i32_31 : i32
    %105 = tpu.assume_multiple %104, 8 : i32
    %106 = arith.index_cast %102 : i32 to index
    %c0_32 = arith.constant 0 : index
    %107 = vector.load %arg8[%106, %c0_32] : memref<64x256xf32, #tpu.memory_space<vmem>>, vector<8x128xf32>
    %108 = arith.index_cast %105 : i32 to index
    %c128_33 = arith.constant 128 : index
    %109 = vector.load %arg8[%108, %c128_33] : memref<64x256xf32, #tpu.memory_space<vmem>>, vector<8x128xf32>
    %c0_34 = arith.constant 0 : index
    %c0_35 = arith.constant 0 : index
    %110 = vector.load %arg3[%c0_34, %c0_35] : memref<32x256xf32, #tpu.memory_space<vmem>>, vector<32x256xf32>
    %cst_36 = arith.constant dense<0.000000e+00> : vector<16x256xf32>
    %111 = tpu.matmul %95, %110, %cst_36 {dimension_numbers = #tpu.dot_dimension_numbers<[1], [0], [0], [1], [0, 0, 1, 1], [], []>} : vector<16x32xf32>, vector<32x256xf32>, vector<16x256xf32> -> vector<16x256xf32>
    %112 = vector.extract_strided_slice %111 {offsets = [0, 0], sizes = [8, 128], strides = [1, 1]} : vector<16x256xf32> to vector<8x128xf32>
    %113 = arith.addf %112, %107 : vector<8x128xf32>
    %114 = vector.extract_strided_slice %111 {offsets = [8, 128], sizes = [8, 128], strides = [1, 1]} : vector<16x256xf32> to vector<8x128xf32>
    %115 = arith.addf %114, %109 : vector<8x128xf32>
    %116 = tpu.concatenate %113, %115 in 0 : vector<8x128xf32>, vector<8x128xf32> -> vector<16x128xf32>
    %117 = vector.extract_strided_slice %116 {offsets = [0, 0], sizes = [16, 32], strides = [1, 1]} : vector<16x128xf32> to vector<16x32xf32>
    %118 = arith.negf %117 : vector<16x32xf32>
    %119 = math.exp %118 : vector<16x32xf32>
    %cst_37 = arith.constant 1.000000e+00 : f32
    %120 = vector.broadcast %cst_37 : f32 to vector<16x32xf32>
    %121 = arith.addf %120, %119 : vector<16x32xf32>
    %122 = arith.divf %120, %121 : vector<16x32xf32>
    %123 = vector.extract_strided_slice %116 {offsets = [0, 32], sizes = [16, 32], strides = [1, 1]} : vector<16x128xf32> to vector<16x32xf32>
    %124 = arith.negf %123 : vector<16x32xf32>
    %125 = math.exp %124 : vector<16x32xf32>
    %cst_38 = arith.constant 1.000000e+00 : f32
    %126 = vector.broadcast %cst_38 : f32 to vector<16x32xf32>
    %127 = arith.addf %126, %125 : vector<16x32xf32>
    %128 = arith.divf %126, %127 : vector<16x32xf32>
    %129 = vector.extract_strided_slice %116 {offsets = [0, 64], sizes = [16, 32], strides = [1, 1]} : vector<16x128xf32> to vector<16x32xf32>
    %130 = math.tanh %129 : vector<16x32xf32>
    %131 = vector.extract_strided_slice %116 {offsets = [0, 96], sizes = [16, 32], strides = [1, 1]} : vector<16x128xf32> to vector<16x32xf32>
    %132 = arith.negf %131 : vector<16x32xf32>
    %133 = math.exp %132 : vector<16x32xf32>
    %cst_39 = arith.constant 1.000000e+00 : f32
    %134 = vector.broadcast %cst_39 : f32 to vector<16x32xf32>
    %135 = arith.addf %134, %133 : vector<16x32xf32>
    %136 = arith.divf %134, %135 : vector<16x32xf32>
    %137 = arith.mulf %128, %93 : vector<16x32xf32>
    %138 = arith.mulf %122, %130 : vector<16x32xf32>
    %139 = arith.addf %137, %138 : vector<16x32xf32>
    %140 = math.tanh %139 : vector<16x32xf32>
    %141 = arith.mulf %136, %140 : vector<16x32xf32>
    %142 = vector.broadcast %c2_i32 : i32 to vector<16x1xi32>
    %143 = arith.cmpi eq, %7, %142 : vector<16x1xi32>
    %144 = vector.shape_cast %143 : vector<16x1xi1> to vector<16x1xi1>
    %145 = vector.broadcast %144 : vector<16x1xi1> to vector<16x32xi1>
    %146 = arith.select %145, %141, %100 : vector<16x32xi1>, vector<16x32xf32>
    %c3_i32 = arith.constant 3 : i32
    %c8_i32_40 = arith.constant 8 : i32
    %147 = arith.muli %c3_i32, %c8_i32_40 : i32
    %148 = tpu.assume_multiple %147, 8 : i32
    %c7_i32_41 = arith.constant 7 : i32
    %149 = arith.subi %c7_i32_41, %c3_i32 : i32
    %c8_i32_42 = arith.constant 8 : i32
    %150 = arith.muli %149, %c8_i32_42 : i32
    %151 = tpu.assume_multiple %150, 8 : i32
    %152 = arith.index_cast %148 : i32 to index
    %c0_43 = arith.constant 0 : index
    %153 = vector.load %arg8[%152, %c0_43] : memref<64x256xf32, #tpu.memory_space<vmem>>, vector<8x128xf32>
    %154 = arith.index_cast %151 : i32 to index
    %c128_44 = arith.constant 128 : index
    %155 = vector.load %arg8[%154, %c128_44] : memref<64x256xf32, #tpu.memory_space<vmem>>, vector<8x128xf32>
    %c0_45 = arith.constant 0 : index
    %c0_46 = arith.constant 0 : index
    %156 = vector.load %arg3[%c0_45, %c0_46] : memref<32x256xf32, #tpu.memory_space<vmem>>, vector<32x256xf32>
    %cst_47 = arith.constant dense<0.000000e+00> : vector<16x256xf32>
    %157 = tpu.matmul %141, %156, %cst_47 {dimension_numbers = #tpu.dot_dimension_numbers<[1], [0], [0], [1], [0, 0, 1, 1], [], []>} : vector<16x32xf32>, vector<32x256xf32>, vector<16x256xf32> -> vector<16x256xf32>
    %158 = vector.extract_strided_slice %157 {offsets = [0, 0], sizes = [8, 128], strides = [1, 1]} : vector<16x256xf32> to vector<8x128xf32>
    %159 = arith.addf %158, %153 : vector<8x128xf32>
    %160 = vector.extract_strided_slice %157 {offsets = [8, 128], sizes = [8, 128], strides = [1, 1]} : vector<16x256xf32> to vector<8x128xf32>
    %161 = arith.addf %160, %155 : vector<8x128xf32>
    %162 = tpu.concatenate %159, %161 in 0 : vector<8x128xf32>, vector<8x128xf32> -> vector<16x128xf32>
    %163 = vector.extract_strided_slice %162 {offsets = [0, 0], sizes = [16, 32], strides = [1, 1]} : vector<16x128xf32> to vector<16x32xf32>
    %164 = arith.negf %163 : vector<16x32xf32>
    %165 = math.exp %164 : vector<16x32xf32>
    %cst_48 = arith.constant 1.000000e+00 : f32
    %166 = vector.broadcast %cst_48 : f32 to vector<16x32xf32>
    %167 = arith.addf %166, %165 : vector<16x32xf32>
    %168 = arith.divf %166, %167 : vector<16x32xf32>
    %169 = vector.extract_strided_slice %162 {offsets = [0, 32], sizes = [16, 32], strides = [1, 1]} : vector<16x128xf32> to vector<16x32xf32>
    %170 = arith.negf %169 : vector<16x32xf32>
    %171 = math.exp %170 : vector<16x32xf32>
    %cst_49 = arith.constant 1.000000e+00 : f32
    %172 = vector.broadcast %cst_49 : f32 to vector<16x32xf32>
    %173 = arith.addf %172, %171 : vector<16x32xf32>
    %174 = arith.divf %172, %173 : vector<16x32xf32>
    %175 = vector.extract_strided_slice %162 {offsets = [0, 64], sizes = [16, 32], strides = [1, 1]} : vector<16x128xf32> to vector<16x32xf32>
    %176 = math.tanh %175 : vector<16x32xf32>
    %177 = vector.extract_strided_slice %162 {offsets = [0, 96], sizes = [16, 32], strides = [1, 1]} : vector<16x128xf32> to vector<16x32xf32>
    %178 = arith.negf %177 : vector<16x32xf32>
    %179 = math.exp %178 : vector<16x32xf32>
    %cst_50 = arith.constant 1.000000e+00 : f32
    %180 = vector.broadcast %cst_50 : f32 to vector<16x32xf32>
    %181 = arith.addf %180, %179 : vector<16x32xf32>
    %182 = arith.divf %180, %181 : vector<16x32xf32>
    %183 = arith.mulf %174, %139 : vector<16x32xf32>
    %184 = arith.mulf %168, %176 : vector<16x32xf32>
    %185 = arith.addf %183, %184 : vector<16x32xf32>
    %186 = math.tanh %185 : vector<16x32xf32>
    %187 = arith.mulf %182, %186 : vector<16x32xf32>
    %188 = vector.broadcast %c3_i32 : i32 to vector<16x1xi32>
    %189 = arith.cmpi eq, %7, %188 : vector<16x1xi32>
    %190 = vector.shape_cast %189 : vector<16x1xi1> to vector<16x1xi1>
    %191 = vector.broadcast %190 : vector<16x1xi1> to vector<16x32xi1>
    %192 = arith.select %191, %187, %146 : vector<16x32xi1>, vector<16x32xf32>
    %c4_i32 = arith.constant 4 : i32
    %c8_i32_51 = arith.constant 8 : i32
    %193 = arith.muli %c4_i32, %c8_i32_51 : i32
    %194 = tpu.assume_multiple %193, 8 : i32
    %c7_i32_52 = arith.constant 7 : i32
    %195 = arith.subi %c7_i32_52, %c4_i32 : i32
    %c8_i32_53 = arith.constant 8 : i32
    %196 = arith.muli %195, %c8_i32_53 : i32
    %197 = tpu.assume_multiple %196, 8 : i32
    %198 = arith.index_cast %194 : i32 to index
    %c0_54 = arith.constant 0 : index
    %199 = vector.load %arg8[%198, %c0_54] : memref<64x256xf32, #tpu.memory_space<vmem>>, vector<8x128xf32>
    %200 = arith.index_cast %197 : i32 to index
    %c128_55 = arith.constant 128 : index
    %201 = vector.load %arg8[%200, %c128_55] : memref<64x256xf32, #tpu.memory_space<vmem>>, vector<8x128xf32>
    %c0_56 = arith.constant 0 : index
    %c0_57 = arith.constant 0 : index
    %202 = vector.load %arg3[%c0_56, %c0_57] : memref<32x256xf32, #tpu.memory_space<vmem>>, vector<32x256xf32>
    %cst_58 = arith.constant dense<0.000000e+00> : vector<16x256xf32>
    %203 = tpu.matmul %187, %202, %cst_58 {dimension_numbers = #tpu.dot_dimension_numbers<[1], [0], [0], [1], [0, 0, 1, 1], [], []>} : vector<16x32xf32>, vector<32x256xf32>, vector<16x256xf32> -> vector<16x256xf32>
    %204 = vector.extract_strided_slice %203 {offsets = [0, 0], sizes = [8, 128], strides = [1, 1]} : vector<16x256xf32> to vector<8x128xf32>
    %205 = arith.addf %204, %199 : vector<8x128xf32>
    %206 = vector.extract_strided_slice %203 {offsets = [8, 128], sizes = [8, 128], strides = [1, 1]} : vector<16x256xf32> to vector<8x128xf32>
    %207 = arith.addf %206, %201 : vector<8x128xf32>
    %208 = tpu.concatenate %205, %207 in 0 : vector<8x128xf32>, vector<8x128xf32> -> vector<16x128xf32>
    %209 = vector.extract_strided_slice %208 {offsets = [0, 0], sizes = [16, 32], strides = [1, 1]} : vector<16x128xf32> to vector<16x32xf32>
    %210 = arith.negf %209 : vector<16x32xf32>
    %211 = math.exp %210 : vector<16x32xf32>
    %cst_59 = arith.constant 1.000000e+00 : f32
    %212 = vector.broadcast %cst_59 : f32 to vector<16x32xf32>
    %213 = arith.addf %212, %211 : vector<16x32xf32>
    %214 = arith.divf %212, %213 : vector<16x32xf32>
    %215 = vector.extract_strided_slice %208 {offsets = [0, 32], sizes = [16, 32], strides = [1, 1]} : vector<16x128xf32> to vector<16x32xf32>
    %216 = arith.negf %215 : vector<16x32xf32>
    %217 = math.exp %216 : vector<16x32xf32>
    %cst_60 = arith.constant 1.000000e+00 : f32
    %218 = vector.broadcast %cst_60 : f32 to vector<16x32xf32>
    %219 = arith.addf %218, %217 : vector<16x32xf32>
    %220 = arith.divf %218, %219 : vector<16x32xf32>
    %221 = vector.extract_strided_slice %208 {offsets = [0, 64], sizes = [16, 32], strides = [1, 1]} : vector<16x128xf32> to vector<16x32xf32>
    %222 = math.tanh %221 : vector<16x32xf32>
    %223 = vector.extract_strided_slice %208 {offsets = [0, 96], sizes = [16, 32], strides = [1, 1]} : vector<16x128xf32> to vector<16x32xf32>
    %224 = arith.negf %223 : vector<16x32xf32>
    %225 = math.exp %224 : vector<16x32xf32>
    %cst_61 = arith.constant 1.000000e+00 : f32
    %226 = vector.broadcast %cst_61 : f32 to vector<16x32xf32>
    %227 = arith.addf %226, %225 : vector<16x32xf32>
    %228 = arith.divf %226, %227 : vector<16x32xf32>
    %229 = arith.mulf %220, %185 : vector<16x32xf32>
    %230 = arith.mulf %214, %222 : vector<16x32xf32>
    %231 = arith.addf %229, %230 : vector<16x32xf32>
    %232 = math.tanh %231 : vector<16x32xf32>
    %233 = arith.mulf %228, %232 : vector<16x32xf32>
    %234 = vector.broadcast %c4_i32 : i32 to vector<16x1xi32>
    %235 = arith.cmpi eq, %7, %234 : vector<16x1xi32>
    %236 = vector.shape_cast %235 : vector<16x1xi1> to vector<16x1xi1>
    %237 = vector.broadcast %236 : vector<16x1xi1> to vector<16x32xi1>
    %238 = arith.select %237, %233, %192 : vector<16x32xi1>, vector<16x32xf32>
    %c5_i32 = arith.constant 5 : i32
    %c8_i32_62 = arith.constant 8 : i32
    %239 = arith.muli %c5_i32, %c8_i32_62 : i32
    %240 = tpu.assume_multiple %239, 8 : i32
    %c7_i32_63 = arith.constant 7 : i32
    %241 = arith.subi %c7_i32_63, %c5_i32 : i32
    %c8_i32_64 = arith.constant 8 : i32
    %242 = arith.muli %241, %c8_i32_64 : i32
    %243 = tpu.assume_multiple %242, 8 : i32
    %244 = arith.index_cast %240 : i32 to index
    %c0_65 = arith.constant 0 : index
    %245 = vector.load %arg8[%244, %c0_65] : memref<64x256xf32, #tpu.memory_space<vmem>>, vector<8x128xf32>
    %246 = arith.index_cast %243 : i32 to index
    %c128_66 = arith.constant 128 : index
    %247 = vector.load %arg8[%246, %c128_66] : memref<64x256xf32, #tpu.memory_space<vmem>>, vector<8x128xf32>
    %c0_67 = arith.constant 0 : index
    %c0_68 = arith.constant 0 : index
    %248 = vector.load %arg3[%c0_67, %c0_68] : memref<32x256xf32, #tpu.memory_space<vmem>>, vector<32x256xf32>
    %cst_69 = arith.constant dense<0.000000e+00> : vector<16x256xf32>
    %249 = tpu.matmul %233, %248, %cst_69 {dimension_numbers = #tpu.dot_dimension_numbers<[1], [0], [0], [1], [0, 0, 1, 1], [], []>} : vector<16x32xf32>, vector<32x256xf32>, vector<16x256xf32> -> vector<16x256xf32>
    %250 = vector.extract_strided_slice %249 {offsets = [0, 0], sizes = [8, 128], strides = [1, 1]} : vector<16x256xf32> to vector<8x128xf32>
    %251 = arith.addf %250, %245 : vector<8x128xf32>
    %252 = vector.extract_strided_slice %249 {offsets = [8, 128], sizes = [8, 128], strides = [1, 1]} : vector<16x256xf32> to vector<8x128xf32>
    %253 = arith.addf %252, %247 : vector<8x128xf32>
    %254 = tpu.concatenate %251, %253 in 0 : vector<8x128xf32>, vector<8x128xf32> -> vector<16x128xf32>
    %255 = vector.extract_strided_slice %254 {offsets = [0, 0], sizes = [16, 32], strides = [1, 1]} : vector<16x128xf32> to vector<16x32xf32>
    %256 = arith.negf %255 : vector<16x32xf32>
    %257 = math.exp %256 : vector<16x32xf32>
    %cst_70 = arith.constant 1.000000e+00 : f32
    %258 = vector.broadcast %cst_70 : f32 to vector<16x32xf32>
    %259 = arith.addf %258, %257 : vector<16x32xf32>
    %260 = arith.divf %258, %259 : vector<16x32xf32>
    %261 = vector.extract_strided_slice %254 {offsets = [0, 32], sizes = [16, 32], strides = [1, 1]} : vector<16x128xf32> to vector<16x32xf32>
    %262 = arith.negf %261 : vector<16x32xf32>
    %263 = math.exp %262 : vector<16x32xf32>
    %cst_71 = arith.constant 1.000000e+00 : f32
    %264 = vector.broadcast %cst_71 : f32 to vector<16x32xf32>
    %265 = arith.addf %264, %263 : vector<16x32xf32>
    %266 = arith.divf %264, %265 : vector<16x32xf32>
    %267 = vector.extract_strided_slice %254 {offsets = [0, 64], sizes = [16, 32], strides = [1, 1]} : vector<16x128xf32> to vector<16x32xf32>
    %268 = math.tanh %267 : vector<16x32xf32>
    %269 = vector.extract_strided_slice %254 {offsets = [0, 96], sizes = [16, 32], strides = [1, 1]} : vector<16x128xf32> to vector<16x32xf32>
    %270 = arith.negf %269 : vector<16x32xf32>
    %271 = math.exp %270 : vector<16x32xf32>
    %cst_72 = arith.constant 1.000000e+00 : f32
    %272 = vector.broadcast %cst_72 : f32 to vector<16x32xf32>
    %273 = arith.addf %272, %271 : vector<16x32xf32>
    %274 = arith.divf %272, %273 : vector<16x32xf32>
    %275 = arith.mulf %266, %231 : vector<16x32xf32>
    %276 = arith.mulf %260, %268 : vector<16x32xf32>
    %277 = arith.addf %275, %276 : vector<16x32xf32>
    %278 = math.tanh %277 : vector<16x32xf32>
    %279 = arith.mulf %274, %278 : vector<16x32xf32>
    %280 = vector.broadcast %c5_i32 : i32 to vector<16x1xi32>
    %281 = arith.cmpi eq, %7, %280 : vector<16x1xi32>
    %282 = vector.shape_cast %281 : vector<16x1xi1> to vector<16x1xi1>
    %283 = vector.broadcast %282 : vector<16x1xi1> to vector<16x32xi1>
    %284 = arith.select %283, %279, %238 : vector<16x32xi1>, vector<16x32xf32>
    %c6_i32 = arith.constant 6 : i32
    %c8_i32_73 = arith.constant 8 : i32
    %285 = arith.muli %c6_i32, %c8_i32_73 : i32
    %286 = tpu.assume_multiple %285, 8 : i32
    %c7_i32_74 = arith.constant 7 : i32
    %287 = arith.subi %c7_i32_74, %c6_i32 : i32
    %c8_i32_75 = arith.constant 8 : i32
    %288 = arith.muli %287, %c8_i32_75 : i32
    %289 = tpu.assume_multiple %288, 8 : i32
    %290 = arith.index_cast %286 : i32 to index
    %c0_76 = arith.constant 0 : index
    %291 = vector.load %arg8[%290, %c0_76] : memref<64x256xf32, #tpu.memory_space<vmem>>, vector<8x128xf32>
    %292 = arith.index_cast %289 : i32 to index
    %c128_77 = arith.constant 128 : index
    %293 = vector.load %arg8[%292, %c128_77] : memref<64x256xf32, #tpu.memory_space<vmem>>, vector<8x128xf32>
    %c0_78 = arith.constant 0 : index
    %c0_79 = arith.constant 0 : index
    %294 = vector.load %arg3[%c0_78, %c0_79] : memref<32x256xf32, #tpu.memory_space<vmem>>, vector<32x256xf32>
    %cst_80 = arith.constant dense<0.000000e+00> : vector<16x256xf32>
    %295 = tpu.matmul %279, %294, %cst_80 {dimension_numbers = #tpu.dot_dimension_numbers<[1], [0], [0], [1], [0, 0, 1, 1], [], []>} : vector<16x32xf32>, vector<32x256xf32>, vector<16x256xf32> -> vector<16x256xf32>
    %296 = vector.extract_strided_slice %295 {offsets = [0, 0], sizes = [8, 128], strides = [1, 1]} : vector<16x256xf32> to vector<8x128xf32>
    %297 = arith.addf %296, %291 : vector<8x128xf32>
    %298 = vector.extract_strided_slice %295 {offsets = [8, 128], sizes = [8, 128], strides = [1, 1]} : vector<16x256xf32> to vector<8x128xf32>
    %299 = arith.addf %298, %293 : vector<8x128xf32>
    %300 = tpu.concatenate %297, %299 in 0 : vector<8x128xf32>, vector<8x128xf32> -> vector<16x128xf32>
    %301 = vector.extract_strided_slice %300 {offsets = [0, 0], sizes = [16, 32], strides = [1, 1]} : vector<16x128xf32> to vector<16x32xf32>
    %302 = arith.negf %301 : vector<16x32xf32>
    %303 = math.exp %302 : vector<16x32xf32>
    %cst_81 = arith.constant 1.000000e+00 : f32
    %304 = vector.broadcast %cst_81 : f32 to vector<16x32xf32>
    %305 = arith.addf %304, %303 : vector<16x32xf32>
    %306 = arith.divf %304, %305 : vector<16x32xf32>
    %307 = vector.extract_strided_slice %300 {offsets = [0, 32], sizes = [16, 32], strides = [1, 1]} : vector<16x128xf32> to vector<16x32xf32>
    %308 = arith.negf %307 : vector<16x32xf32>
    %309 = math.exp %308 : vector<16x32xf32>
    %cst_82 = arith.constant 1.000000e+00 : f32
    %310 = vector.broadcast %cst_82 : f32 to vector<16x32xf32>
    %311 = arith.addf %310, %309 : vector<16x32xf32>
    %312 = arith.divf %310, %311 : vector<16x32xf32>
    %313 = vector.extract_strided_slice %300 {offsets = [0, 64], sizes = [16, 32], strides = [1, 1]} : vector<16x128xf32> to vector<16x32xf32>
    %314 = math.tanh %313 : vector<16x32xf32>
    %315 = vector.extract_strided_slice %300 {offsets = [0, 96], sizes = [16, 32], strides = [1, 1]} : vector<16x128xf32> to vector<16x32xf32>
    %316 = arith.negf %315 : vector<16x32xf32>
    %317 = math.exp %316 : vector<16x32xf32>
    %cst_83 = arith.constant 1.000000e+00 : f32
    %318 = vector.broadcast %cst_83 : f32 to vector<16x32xf32>
    %319 = arith.addf %318, %317 : vector<16x32xf32>
    %320 = arith.divf %318, %319 : vector<16x32xf32>
    %321 = arith.mulf %312, %277 : vector<16x32xf32>
    %322 = arith.mulf %306, %314 : vector<16x32xf32>
    %323 = arith.addf %321, %322 : vector<16x32xf32>
    %324 = math.tanh %323 : vector<16x32xf32>
    %325 = arith.mulf %320, %324 : vector<16x32xf32>
    %326 = vector.broadcast %c6_i32 : i32 to vector<16x1xi32>
    %327 = arith.cmpi eq, %7, %326 : vector<16x1xi32>
    %328 = vector.shape_cast %327 : vector<16x1xi1> to vector<16x1xi1>
    %329 = vector.broadcast %328 : vector<16x1xi1> to vector<16x32xi1>
    %330 = arith.select %329, %325, %284 : vector<16x32xi1>, vector<16x32xf32>
    %c7_i32_84 = arith.constant 7 : i32
    %c8_i32_85 = arith.constant 8 : i32
    %331 = arith.muli %c7_i32_84, %c8_i32_85 : i32
    %332 = tpu.assume_multiple %331, 8 : i32
    %c7_i32_86 = arith.constant 7 : i32
    %333 = arith.subi %c7_i32_86, %c7_i32_84 : i32
    %c8_i32_87 = arith.constant 8 : i32
    %334 = arith.muli %333, %c8_i32_87 : i32
    %335 = tpu.assume_multiple %334, 8 : i32
    %336 = arith.index_cast %332 : i32 to index
    %c0_88 = arith.constant 0 : index
    %337 = vector.load %arg8[%336, %c0_88] : memref<64x256xf32, #tpu.memory_space<vmem>>, vector<8x128xf32>
    %338 = arith.index_cast %335 : i32 to index
    %c128_89 = arith.constant 128 : index
    %339 = vector.load %arg8[%338, %c128_89] : memref<64x256xf32, #tpu.memory_space<vmem>>, vector<8x128xf32>
    %c0_90 = arith.constant 0 : index
    %c0_91 = arith.constant 0 : index
    %340 = vector.load %arg3[%c0_90, %c0_91] : memref<32x256xf32, #tpu.memory_space<vmem>>, vector<32x256xf32>
    %cst_92 = arith.constant dense<0.000000e+00> : vector<16x256xf32>
    %341 = tpu.matmul %325, %340, %cst_92 {dimension_numbers = #tpu.dot_dimension_numbers<[1], [0], [0], [1], [0, 0, 1, 1], [], []>} : vector<16x32xf32>, vector<32x256xf32>, vector<16x256xf32> -> vector<16x256xf32>
    %342 = vector.extract_strided_slice %341 {offsets = [0, 0], sizes = [8, 128], strides = [1, 1]} : vector<16x256xf32> to vector<8x128xf32>
    %343 = arith.addf %342, %337 : vector<8x128xf32>
    %344 = vector.extract_strided_slice %341 {offsets = [8, 128], sizes = [8, 128], strides = [1, 1]} : vector<16x256xf32> to vector<8x128xf32>
    %345 = arith.addf %344, %339 : vector<8x128xf32>
    %346 = tpu.concatenate %343, %345 in 0 : vector<8x128xf32>, vector<8x128xf32> -> vector<16x128xf32>
    %347 = vector.extract_strided_slice %346 {offsets = [0, 0], sizes = [16, 32], strides = [1, 1]} : vector<16x128xf32> to vector<16x32xf32>
    %348 = arith.negf %347 : vector<16x32xf32>
    %349 = math.exp %348 : vector<16x32xf32>
    %cst_93 = arith.constant 1.000000e+00 : f32
    %350 = vector.broadcast %cst_93 : f32 to vector<16x32xf32>
    %351 = arith.addf %350, %349 : vector<16x32xf32>
    %352 = arith.divf %350, %351 : vector<16x32xf32>
    %353 = vector.extract_strided_slice %346 {offsets = [0, 32], sizes = [16, 32], strides = [1, 1]} : vector<16x128xf32> to vector<16x32xf32>
    %354 = arith.negf %353 : vector<16x32xf32>
    %355 = math.exp %354 : vector<16x32xf32>
    %cst_94 = arith.constant 1.000000e+00 : f32
    %356 = vector.broadcast %cst_94 : f32 to vector<16x32xf32>
    %357 = arith.addf %356, %355 : vector<16x32xf32>
    %358 = arith.divf %356, %357 : vector<16x32xf32>
    %359 = vector.extract_strided_slice %346 {offsets = [0, 64], sizes = [16, 32], strides = [1, 1]} : vector<16x128xf32> to vector<16x32xf32>
    %360 = math.tanh %359 : vector<16x32xf32>
    %361 = vector.extract_strided_slice %346 {offsets = [0, 96], sizes = [16, 32], strides = [1, 1]} : vector<16x128xf32> to vector<16x32xf32>
    %362 = arith.negf %361 : vector<16x32xf32>
    %363 = math.exp %362 : vector<16x32xf32>
    %cst_95 = arith.constant 1.000000e+00 : f32
    %364 = vector.broadcast %cst_95 : f32 to vector<16x32xf32>
    %365 = arith.addf %364, %363 : vector<16x32xf32>
    %366 = arith.divf %364, %365 : vector<16x32xf32>
    %367 = arith.mulf %358, %323 : vector<16x32xf32>
    %368 = arith.mulf %352, %360 : vector<16x32xf32>
    %369 = arith.addf %367, %368 : vector<16x32xf32>
    %370 = math.tanh %369 : vector<16x32xf32>
    %371 = arith.mulf %366, %370 : vector<16x32xf32>
    %372 = vector.broadcast %c7_i32_84 : i32 to vector<16x1xi32>
    %373 = arith.cmpi eq, %7, %372 : vector<16x1xi32>
    %374 = vector.shape_cast %373 : vector<16x1xi1> to vector<16x1xi1>
    %375 = vector.broadcast %374 : vector<16x1xi1> to vector<16x32xi1>
    %376 = arith.select %375, %371, %330 : vector<16x32xi1>, vector<16x32xf32>
    %c8_i32_96 = arith.constant 8 : i32
    %377 = vector.extract_strided_slice %376 {offsets = [0, 0], sizes = [8, 32], strides = [1, 1]} : vector<16x32xf32> to vector<8x32xf32>
    %378 = vector.extract_strided_slice %376 {offsets = [8, 0], sizes = [8, 32], strides = [1, 1]} : vector<16x32xf32> to vector<8x32xf32>
    %379 = tpu.concatenate %377, %378 in 1 : vector<8x32xf32>, vector<8x32xf32> -> vector<8x64xf32>
    %c0_97 = arith.constant 0 : index
    %c0_98 = arith.constant 0 : index
    %380 = vector.load %arg5[%c0_97, %c0_98] : memref<64x8xf32, #tpu.memory_space<vmem>>, vector<64x8xf32>
    %cst_99 = arith.constant dense<0.000000e+00> : vector<8x8xf32>
    %381 = tpu.matmul %379, %380, %cst_99 {dimension_numbers = #tpu.dot_dimension_numbers<[1], [0], [0], [1], [0, 0, 1, 1], [], []>} : vector<8x64xf32>, vector<64x8xf32>, vector<8x8xf32> -> vector<8x8xf32>
    %c0_100 = arith.constant 0 : index
    %c0_101 = arith.constant 0 : index
    %382 = vector.load %arg6[%c0_100, %c0_101] : memref<1x8xf32, #tpu.memory_space<vmem>>, vector<1x8xf32>
    %383 = vector.broadcast %382 : vector<1x8xf32> to vector<8x8xf32>
    %384 = arith.addf %381, %383 : vector<8x8xf32>
    %c0_102 = arith.constant 0 : index
    %c0_103 = arith.constant 0 : index
    %385 = vector.load %arg7[%c0_102, %c0_103] : memref<8x8xf32, #tpu.memory_space<vmem>>, vector<8x8xf32>
    tpu.vector_store %arg7[%c0_102, %c0_103], %384 {strides = array<i32>} : memref<8x8xf32, #tpu.memory_space<vmem>>, vector<8x8xf32>,
    return
  }
}

</mosaic_0001>

<bundles_post_ra>
// kernel: tpu_custom_call.1
= control target key start
LH: loop header
LB: loop body
LE: loop exit
PB: predicated region body
PF: predicated region fallthrough
CT: control target
= control target key end

     0   :  { %vm45_vm0 = vcmask 130048   ;;  %s2192_s0 = inlined_call_operand.vmem [shape: s32[16,1], index: 0, kind: input, shape index: {}]   ;;  %s2193_s1 = inlined_call_operand.vmem [shape: f32[64,16], index: 1, kind: input, shape index: {}]   ;;  %s2194_s2 = inlined_call_operand.vmem [shape: f32[16,256], index: 2, kind: input, shape index: {}]   ;;  %s2195_s3 = inlined_call_operand.vmem [shape: f32[32,256], index: 3, kind: input, shape index: {}]   ;;  %s2196_s4 = inlined_call_operand.vmem [shape: f32[1,256], index: 4, kind: input, shape index: {}]   ;;  %s2197_s5 = inlined_call_operand.vmem [shape: f32[64,8], index: 5, kind: input, shape index: {}]   ;;  %s2198_s6 = inlined_call_operand.vmem [shape: f32[1,8], index: 6, kind: input, shape index: {}]   ;;  %s2199_s7 = inlined_call_operand.hbm [shape: f32[8,8], index: 7, kind: output, shape index: {}]  }
   0x1   :  { %v38_v0 = vld [vmem:[%s2194_s2 + $0x18] sm:$0xff]  ;;  %v1709_v1 = vld [vmem:[%s2195_s3 + $0x30] sm:$0xff]  ;;  %v36_v2 = vld [vmem:[%s2194_s2 + $0x8] sm:$0xff] }
   0x2   :  { %125 = vmatpush.msra.mxu1 %v38_v0  ;;  %202 = vmatpush.msra.mxu2 %v1709_v1  ;;  %v1718_v3 = vld [vmem:[%s2195_s3 + $0x20] sm:$0xff]  ;;  %v1726_v5 = vld [vmem:[%s2195_s3 + $0x10] sm:$0xff]  ;;  %v1744_v9 = vld [vmem:[%s2195_s3 + $0x38] sm:$0xff] }
   0x3   :  { %v27_v4 = vld [vmem:[%s2193_s1] sm:$0xff]  ;;  %v37_v6 = vld [vmem:[%s2194_s2 + $0x10] sm:$0xff]  ;;  %224 = vmatpush.msra.mxu3 %v1744_v9  ;;  %v1751_v10 = vld [vmem:[%s2195_s3 + $0x28] sm:$0xff] }
   0x4   :  { %126 = vmatpush.msra.mxu1 %v36_v2  ;;  %203 = vmatpush.msra.mxu2 %v1718_v3  ;;  %v35_v7 = vld [vmem:[%s2194_s2] sm:$0xff] }
   0x5   :  { %1442 = vmatmul.msk.f32.vlgmr.msra.gmra.mxu1 %vm45_vm0, %v27_v4  ;;  %v1739_v8 = vld [vmem:[%s2195_s3] sm:$0xff]  ;;  %84 = vmatpush.msra.mxu0 %v37_v6 }
   0x6   :  { %204 = vmatpush.msra.mxu2 %v1726_v5 }
   0x7   :  { %12 = vsyncpa [#allocation4], 0  ;;  %85 = vmatpush.msra.mxu0 %v35_v7  ;;  %826 = vmatpush.msrb.mxu1 %v1744_v9  ;;  %v1658_v11 = vmov 0.0   ;;  %v28_v12 = vld [vmem:[%s2193_s1 + $0x8] sm:$0xff]  ;;  %v1769_v13 = vld [vmem:[%s2195_s3 + $0x18] sm:$0xff]  ;;  %vm186_vm9 = vcmask 261120  }
   0x8   :  { %205 = vmatpush.msra.mxu2 %v1739_v8  ;;  %1434 = vmatmul.msk.f32.vlgmr.msra.gmra.mxu0 %vm45_vm0, %v27_v4  ;;  %v1774_v14 = vld [vmem:[%s2195_s3 + $0x8] sm:$0xff]  ;;  %v29_v15 = vld [vmem:[%s2193_s1 + $0x10] sm:$0xff]  ;;  %v30_v16 = vld [vmem:[%s2193_s1 + $0x18] sm:$0xff]  ;;  %s1662_s14 = smov [#allocation3]  }
   0x9   :  { %206 = vmatmul.f32.vlgmr.msra.gmra.mxu2 %v1658_v11  ;;  %225 = vmatpush.msra.mxu3 %v1751_v10  ;;  %v31_v17 = vld [vmem:[%s2193_s1 + $0x20] sm:$0xff]  ;;  %v32_v18 = vld [vmem:[%s2193_s1 + $0x28] sm:$0xff]  ;;  %v33_v19 = vld [vmem:[%s2193_s1 + $0x30] sm:$0xff]  ;;  %s1416_s15 = sshll.u32 %s1662_s14, 4  ;;  %s1417_s15 = int_to_ptr.vmem [resolvable:$true] %s1416_s15 }
   0xa   :  { %354 = vmatpush.msrb.mxu2 %v1709_v1  ;;  %804 = vmatpush.msrb.mxu0 %v1709_v1  ;;  %v34_v20 = vld [vmem:[%s2193_s1 + $0x38] sm:$0xff]  ;;  %v39_v21 = vld [vmem:[%s2196_s4] sm:$0x3]  ;;  %s1659_s1 = smov 64   ;;  %s1660_s4 = smov 32  }
   0xb   :  { %827 = vmatpush.msrb.mxu1 %v1751_v10  ;;  %226 = vmatpush.msra.mxu3 %v1769_v13  ;;  %v42_v22 = vperm.slane %v39_v21, 1  ;;  %v1840_v25 = vperm.slane %v39_v21, 0 }
   0xc   :  { %355 = vmatpush.msrb.mxu2 %v1718_v3  ;;  %805 = vmatpush.msrb.mxu0 %v1718_v3 }
   0xd   :  { %1443 = vmatmul.msk.f32.gmra.mxu1 %vm45_vm0, %v28_v12  ;;  %227 = vmatpush.msra.mxu3 %v1774_v14 }
   0xe   :  { %356 = vmatpush.msrb.mxu2 %v1726_v5  ;;  %806 = vmatpush.msrb.mxu0 %v1726_v5 }
   0xf   :  { %828 = vmatpush.msrb.mxu1 %v1769_v13  ;;  %228 = vmatmul.f32.vlgmr.msra.gmra.mxu3 %v1658_v11 }
  0x10   :  { %357 = vmatpush.msrb.mxu2 %v1739_v8  ;;  %376 = vmatpush.msrb.mxu3 %v1744_v9 }
  0x11   :  { %209 = vmatmul.f32.gmra.mxu2 %v1658_v11  ;;  %1435 = vmatmul.msk.f32.gmra.mxu0 %vm45_vm0, %v28_v12 }
  0x12   :  { %506 = vmatpush.msra.mxu2 %v1709_v1  ;;  %807 = vmatpush.msrb.mxu0 %v1739_v8 }
  0x13   :  { %377 = vmatpush.msrb.mxu3 %v1751_v10  ;;  %829 = vmatpush.msrb.mxu1 %v1774_v14 }
  0x14   :  { %507 = vmatpush.msra.mxu2 %v1718_v3  ;;  %1096 = vmatpush.msra.mxu0 %v1709_v1 }
  0x15   :  { %1444 = vmatmul.msk.f32.gmra.mxu1 %vm45_vm0, %v29_v15  ;;  %378 = vmatpush.msrb.mxu3 %v1769_v13 }
  0x16   :  { %508 = vmatpush.msra.mxu2 %v1726_v5  ;;  %1118 = vmatpush.msra.mxu1 %v1744_v9 }
  0x17   :  { %379 = vmatpush.msrb.mxu3 %v1774_v14  ;;  %1097 = vmatpush.msra.mxu0 %v1718_v3 }
  0x18   :  { %230 = vmatmul.f32.gmra.mxu3 %v1658_v11  ;;  %509 = vmatpush.msra.mxu2 %v1739_v8 }
  0x19   :  { %528 = vmatpush.msra.mxu3 %v1744_v9  ;;  %1436 = vmatmul.msk.f32.gmra.mxu0 %vm45_vm0, %v29_v15 }
  0x1a   :  { %1119 = vmatpush.msra.mxu1 %v1751_v10  ;;  %1098 = vmatpush.msra.mxu0 %v1726_v5 }
  0x1b   :  { %529 = vmatpush.msra.mxu3 %v1751_v10 }
  0x1c   :  { %1099 = vmatpush.msra.mxu0 %v1739_v8  ;;  %1120 = vmatpush.msra.mxu1 %v1769_v13 }
  0x1d   :  { %1445 = vmatmul.msk.f32.gmra.mxu1 %vm45_vm0, %v30_v16  ;;  %530 = vmatpush.msra.mxu3 %v1769_v13 }
  0x1e   :  { %1121 = vmatpush.msra.mxu1 %v1774_v14 }
  0x1f   :  { %531 = vmatpush.msra.mxu3 %v1774_v14 }
  0x21   :  { %1437 = vmatmul.msk.f32.gmra.mxu0 %vm45_vm0, %v30_v16 }
  0x25   :  { %1446 = vmatmul.msk.f32.gmra.mxu1 %vm45_vm0, %v31_v17 }
  0x29   :  { %1438 = vmatmul.msk.f32.gmra.mxu0 %vm45_vm0, %v31_v17 }
  0x2d   :  { %1447 = vmatmul.msk.f32.gmra.mxu1 %vm45_vm0, %v32_v18 }
  0x31   :  { %1439 = vmatmul.msk.f32.gmra.mxu0 %vm45_vm0, %v32_v18 }
  0x35   :  { %1448 = vmatmul.msk.f32.gmra.mxu1 %vm45_vm0, %v33_v19 }
  0x39   :  { %1440 = vmatmul.msk.f32.gmra.mxu0 %vm45_vm0, %v33_v19 }
  0x3d   :  { %1449 = vmatmul.msk.f32.gmra.mxu1 %vm45_vm0, %v34_v20 }
  0x41   :  { %1441 = vmatmul.msk.f32.gmra.mxu0 %vm45_vm0, %v34_v20 }
  0x82   :  { %v128_v23 = vpop.f32.mrf.mxu1 }
  0x83   :  { %v1838_v24 = vadd.f32 %v128_v23, %v42_v22 }
  0x85   :  { %v87_v26 = vpop.f32.mrf.mxu0 }
  0x86   :  { %v88_v27 = vadd.f32 %v87_v26, %v1840_v25 }
  0x8a   :  { %v131_v28 = vpop.f32.mrf.mxu1 }
  0x8b   :  { %v1843_v29 = vadd.f32 %v131_v28, %v42_v22 }
  0x8c   :  { %v207_v30 = vpop.f32.mrf.mxu2 }
  0x8d   :  { %v234_v31 = vadd.f32 %v207_v30, %v88_v27 }
  0x8f   :  { %1504 = vtanh.f32 %v234_v31  ;;  %v1450_v50 = vmul.f32 -1.442695, %v234_v31 }
  0x92   :  { %v134_v32 = vpop.f32.mrf.mxu1  ;;  %v229_v34 = vpop.f32.mrf.mxu3 }
  0x93   :  { %v1845_v33 = vadd.f32 %v134_v32, %v42_v22 }
  0x94   :  { %v210_v35 = vpop.f32.mrf.mxu2 }
  0x95   :  { %v1505_v36 = vpop.eup %1504 }
  0x96   :  { %280 = vrot.lane.b32.xlu0 %v1505_v36, %s1659_s1 }
  0x9a   :  { %v137_v37 = vpop.f32.mrf.mxu1 }
  0x9b   :  { %v1848_v38 = vadd.f32 %v137_v37, %v42_v22  ;;  %v231_v46 = vpop.f32.mrf.mxu3 }
  0xa2   :  { %v140_v39 = vpop.f32.mrf.mxu1 }
  0xa3   :  { %v1850_v40 = vadd.f32 %v140_v39, %v42_v22 }
  0xaa   :  { %v143_v41 = vpop.f32.mrf.mxu1 }
  0xab   :  { %v1852_v42 = vadd.f32 %v143_v41, %v42_v22 }
  0xb2   :  { %v146_v43 = vpop.f32.mrf.mxu1 }
  0xb3   :  { %v1854_v44 = vadd.f32 %v146_v43, %v42_v22 }
  0xba   :  { %v149_v45 = vpop.f32.mrf.mxu1 }
  0xbb   :  { %v150_v47 = vadd.f32 %v149_v45, %v42_v22 }
  0xbd   :  { %v235_v48 = vadd.f32 %v231_v46, %v150_v47  ;;  %v90_v46 = vpop.f32.mrf.mxu0 }
  0xbe   :  { %v91_v47 = vadd.f32 %v90_v46, %v1840_v25 }
  0xbf   :  { %1506 = vtanh.f32 %v235_v48  ;;  %v1451_v2 = vmul.f32 -1.442695, %v235_v48 }
  0xc0   :  { %1508 = vpow2.f32 %v1450_v50 }
  0xc5   :  { %v1507_v49 = vpop.eup %1506 }
  0xc6   :  { %282 = vrot.lane.b32.xlu0 %v1507_v49, %s1659_s1  ;;  %v1509_v51 = vpop.eup %1508 }
  0xc7   :  { %v242_v52 = vadd.f32 1.0, %v1509_v51 }
  0xc9   :  { %1510 = vrcp.f32 %v242_v52  ;;  %vm249_vm1 = vweird.f32 %v242_v52  ;;  %v255_v57 = vand.u32 2147483648, %v242_v52  ;;  %v253_v59 = vand.u32 2147483647, %v242_v52 }
  0xca   :  { %1512 = vpow2.f32 %v1451_v2 }
  0xcb   :  { %v256_v60 = vor.u32 1.1754944e-38, %v255_v57  ;;  %vm254_vm4 = vcmp.eq.f32.partialorder %v253_v59, 8.507059e+37 }
  0xcf   :  { %v1511_v53 = vpop.eup %1510 }
  0xd0   :  { %v245_v54 = vmul.f32 %v1511_v53, %v242_v52  ;;  %vm250_vm2 = vweird.f32 %v1511_v53  ;;  %v1513_v4 = vpop.eup %1512 }
  0xd1   :  { %vm251_vm3 = vmor %vm249_vm1, %vm250_vm2  ;;  %v243_v6 = vadd.f32 1.0, %v1513_v4 }
  0xd2   :  { %v246_v55 = vsub.f32 1.0, %v245_v54 }
  0xd3   :  { %1514 = vrcp.f32 %v243_v6  ;;  %v270_v17 = vand.u32 2147483648, %v243_v6  ;;  %vm264_vm6 = vweird.f32 %v243_v6  ;;  %v268_v18 = vand.u32 2147483647, %v243_v6 }
  0xd4   :  { %v247_v56 = vmul.f32 %v1511_v53, %v246_v55 }
  0xd5   :  { %v271_v20 = vor.u32 1.1754944e-38, %v270_v17  ;;  %vm269_vm8 = vcmp.eq.f32.partialorder %v268_v18, 8.507059e+37 }
  0xd6   :  { %v248_v58 = vadd.f32 %v1511_v53, %v247_v56 }
  0xd8   :  { %v252_v61 = vsel %vm251_vm3, %v1511_v53, %v248_v58 }
  0xd9   :  { %v257_v63 = vsel %vm254_vm4, %v256_v60, %v252_v61  ;;  %v1515_v7 = vpop.eup %1514 }
  0xda   :  { %v260_v11 = vmul.f32 %v1515_v7, %v243_v6  ;;  %vm265_vm5 = vweird.f32 %v1515_v7  ;;  %v276_v26 = vmul.f32 0.0, %v257_v63 }
  0xdb   :  { %vm266_vm7 = vmor %vm264_vm6, %vm265_vm5 }
  0xdc   :  { %v261_v12 = vsub.f32 1.0, %v260_v11 }
  0xde   :  { %v262_v15 = vmul.f32 %v1515_v7, %v261_v12 }
  0xe0   :  { %v263_v16 = vadd.f32 %v1515_v7, %v262_v15 }
  0xe2   :  { %v267_v19 = vsel %vm266_vm7, %v1515_v7, %v263_v16 }
  0xe3   :  { %v272_v21 = vsel %vm269_vm8, %v271_v20, %v267_v19 }
  0xe4   :  { %v277_v31 = vmul.f32 0.0, %v272_v21 }
 0x108   :  { %v281_v62 = vpop.permute.xlu0 %280 }
 0x109   :  { %v286_v0 = vmul.f32 %v281_v62, %v257_v63 }
 0x10b   :  { %290 = vrot.lane.b32.xlu1 %v286_v0, %s1660_s4 }
 0x138   :  { %v283_v22 = vpop.permute.xlu0 %282 }
 0x139   :  { %v287_v23 = vmul.f32 %v283_v22, %v272_v21 }
 0x13b   :  { %292 = vrot.lane.b32.xlu1 %v287_v23, %s1660_s4 }
 0x17d   :  { %v291_v27 = vpop.permute.xlu1 %290 }
 0x17e   :  { %v1859_v28 = vadd.f32 %v291_v27, %v276_v26 }
 0x180   :  { %1516 = vtanh.f32 %v1859_v28 }
 0x186   :  { %v1517_v30 = vpop.eup %1516 }
 0x187   :  { %302 = vrot.lane.b32.xlu2 %v1517_v30, %s1659_s1 }
 0x1ad   :  { %v293_v32 = vpop.permute.xlu1 %292 }
 0x1ae   :  { %v1863_v34 = vadd.f32 %v293_v32, %v277_v31 }
 0x1b0   :  { %1518 = vtanh.f32 %v1863_v34 }
 0x1b6   :  { %v1519_v35 = vpop.eup %1518 }
 0x1b7   :  { %304 = vrot.lane.b32.xlu2 %v1519_v35, %s1659_s1 }
 0x1e1   :  { %v303_v36 = vpop.permute.xlu2 %302 }
 0x1e2   :  { %v1867_v37 = vmul.f32 %v303_v36, %v257_v63 }
 0x1e4   :  { %334 = vrot.lane.b32.xlu0 %v1867_v37, %s1660_s4 }
 0x211   :  { %v305_v39 = vpop.permute.xlu2 %304 }
 0x212   :  { %v1871_v41 = vmul.f32 %v305_v39, %v272_v21 }
 0x214   :  { %336 = vrot.lane.b32.xlu1 %v1871_v41, %s1660_s4 }
 0x256   :  { %v335_v43 = vpop.permute.xlu0 %334 }
 0x257   :  { %1452 = vmatmul.msk.f32.vlgmr.msrb.gmra.mxu2 %vm186_vm9, %v335_v43  ;;  %1454 = vmatmul.msk.f32.vlgmr.msrb.gmra.mxu3 %vm186_vm9, %v335_v43 }
 0x258   :  { %658 = vmatpush.msrb.mxu2 %v1709_v1  ;;  %680 = vmatpush.msrb.mxu3 %v1744_v9 }
 0x25a   :  { %659 = vmatpush.msrb.mxu2 %v1718_v3  ;;  %681 = vmatpush.msrb.mxu3 %v1751_v10 }
 0x25c   :  { %660 = vmatpush.msrb.mxu2 %v1726_v5  ;;  %682 = vmatpush.msrb.mxu3 %v1769_v13 }
 0x25e   :  { %661 = vmatpush.msrb.mxu2 %v1739_v8  ;;  %683 = vmatpush.msrb.mxu3 %v1774_v14 }
 0x286   :  { %v337_v45 = vpop.permute.xlu1 %336 }
 0x287   :  { %1453 = vmatmul.msk.f32.gmra.mxu2 %vm186_vm9, %v337_v45  ;;  %1455 = vmatmul.msk.f32.gmra.mxu3 %vm186_vm9, %v337_v45 }
 0x2da   :  { %v359_v48 = vpop.f32.mrf.mxu2  ;;  %v381_v49 = vpop.f32.mrf.mxu3 }
 0x2db   :  { %v386_v50 = vadd.f32 %v359_v48, %v91_v47 }
 0x2dd   :  { %1520 = vtanh.f32 %v386_v50  ;;  %v1456_v55 = vmul.f32 -1.442695, %v386_v50 }
 0x2e3   :  { %v1521_v51 = vpop.eup %1520 }
 0x2e4   :  { %432 = vrot.lane.b32.xlu2 %v1521_v51, %s1659_s1 }
 0x30a   :  { %v362_v52 = vpop.f32.mrf.mxu2  ;;  %v383_v53 = vpop.f32.mrf.mxu3 }
 0x30b   :  { %v387_v54 = vadd.f32 %v383_v53, %v1854_v44  ;;  %v93_v53 = vpop.f32.mrf.mxu0 }
 0x30d   :  { %1522 = vtanh.f32 %v387_v54  ;;  %v1457_v12 = vmul.f32 -1.442695, %v387_v54  ;;  %v94_v54 = vadd.f32 %v93_v53, %v1840_v25 }
 0x30e   :  { %1524 = vpow2.f32 %v1456_v55 }
 0x313   :  { %v1523_v56 = vpop.eup %1522 }
 0x314   :  { %434 = vrot.lane.b32.xlu0 %v1523_v56, %s1659_s1  ;;  %v1525_v57 = vpop.eup %1524 }
 0x315   :  { %v394_v58 = vadd.f32 1.0, %v1525_v57 }
 0x317   :  { %1526 = vrcp.f32 %v394_v58  ;;  %v407_v0 = vand.u32 2147483648, %v394_v58  ;;  %vm401_vm11 = vweird.f32 %v394_v58  ;;  %v405_v2 = vand.u32 2147483647, %v394_v58 }
 0x318   :  { %1528 = vpow2.f32 %v1457_v12 }
 0x319   :  { %v408_v4 = vor.u32 1.1754944e-38, %v407_v0  ;;  %vm406_vm13 = vcmp.eq.f32.partialorder %v405_v2, 8.507059e+37 }
 0x31d   :  { %v1527_v59 = vpop.eup %1526 }
 0x31e   :  { %v397_v60 = vmul.f32 %v1527_v59, %v394_v58  ;;  %vm402_vm10 = vweird.f32 %v1527_v59  ;;  %v1529_v15 = vpop.eup %1528 }
 0x31f   :  { %vm403_vm12 = vmor %vm401_vm11, %vm402_vm10  ;;  %v395_v16 = vadd.f32 1.0, %v1529_v15 }
 0x320   :  { %v398_v61 = vsub.f32 1.0, %v397_v60 }
 0x321   :  { %1530 = vrcp.f32 %v395_v16  ;;  %v422_v22 = vand.u32 2147483648, %v395_v16  ;;  %vm416_vm15 = vweird.f32 %v395_v16  ;;  %v420_v23 = vand.u32 2147483647, %v395_v16 }
 0x322   :  { %v399_v62 = vmul.f32 %v1527_v59, %v398_v61 }
 0x323   :  { %v423_v27 = vor.u32 1.1754944e-38, %v422_v22  ;;  %vm421_vm1 = vcmp.eq.f32.partialorder %v420_v23, 8.507059e+37 }
 0x324   :  { %v400_v63 = vadd.f32 %v1527_v59, %v399_v62 }
 0x326   :  { %v404_v44 = vsel %vm403_vm12, %v1527_v59, %v400_v63 }
 0x327   :  { %v409_v6 = vsel %vm406_vm13, %v408_v4, %v404_v44  ;;  %v1531_v17 = vpop.eup %1530 }
 0x328   :  { %v412_v18 = vmul.f32 %v1531_v17, %v395_v16  ;;  %vm417_vm14 = vweird.f32 %v1531_v17  ;;  %v428_v35 = vmul.f32 %v409_v6, %v1859_v28 }
 0x329   :  { %vm418_vm0 = vmor %vm416_vm15, %vm417_vm14 }
 0x32a   :  { %v413_v19 = vsub.f32 1.0, %v412_v18 }
 0x32c   :  { %v414_v20 = vmul.f32 %v1531_v17, %v413_v19 }
 0x32e   :  { %v415_v21 = vadd.f32 %v1531_v17, %v414_v20 }
 0x330   :  { %v419_v26 = vsel %vm418_vm0, %v1531_v17, %v415_v21 }
 0x331   :  { %v424_v31 = vsel %vm421_vm1, %v423_v27, %v419_v26 }
 0x332   :  { %v429_v45 = vmul.f32 %v424_v31, %v1863_v34 }
 0x33e   :  { %v433_v7 = vpop.permute.xlu2 %432 }
 0x33f   :  { %v438_v11 = vmul.f32 %v433_v7, %v409_v6 }
 0x341   :  { %442 = vrot.lane.b32.xlu1 %v438_v11, %s1660_s4 }
 0x386   :  { %v435_v30 = vpop.permute.xlu0 %434 }
 0x387   :  { %v439_v32 = vmul.f32 %v435_v30, %v424_v31 }
 0x389   :  { %444 = vrot.lane.b32.xlu2 %v439_v32, %s1660_s4 }
 0x3b3   :  { %v443_v36 = vpop.permute.xlu1 %442 }
 0x3b4   :  { %v1894_v39 = vadd.f32 %v443_v36, %v428_v35 }
 0x3b6   :  { %1532 = vtanh.f32 %v1894_v39 }
 0x3bc   :  { %v1533_v43 = vpop.eup %1532 }
 0x3bd   :  { %454 = vrot.lane.b32.xlu0 %v1533_v43, %s1659_s1 }
 0x3e3   :  { %v445_v46 = vpop.permute.xlu2 %444 }
 0x3e4   :  { %v1899_v47 = vadd.f32 %v445_v46, %v429_v45 }
 0x3e6   :  { %1534 = vtanh.f32 %v1899_v47 }
 0x3ec   :  { %v1535_v48 = vpop.eup %1534 }
 0x3ed   :  { %456 = vrot.lane.b32.xlu1 %v1535_v48, %s1659_s1 }
 0x42f   :  { %v455_v49 = vpop.permute.xlu0 %454 }
 0x430   :  { %v1903_v28 = vmul.f32 %v455_v49, %v409_v6 }
 0x432   :  { %486 = vrot.lane.b32.xlu2 %v1903_v28, %s1660_s4 }
 0x45f   :  { %v457_v50 = vpop.permute.xlu1 %456 }
 0x460   :  { %v1907_v51 = vmul.f32 %v457_v50, %v424_v31 }
 0x462   :  { %488 = vrot.lane.b32.xlu0 %v1907_v51, %s1660_s4 }
 0x48c   :  { %v487_v34 = vpop.permute.xlu2 %486 }
 0x48d   :  { %1458 = vmatmul.msk.f32.vlgmr.msra.gmra.mxu2 %vm186_vm9, %v487_v34  ;;  %1460 = vmatmul.msk.f32.vlgmr.msra.gmra.mxu3 %vm186_vm9, %v487_v34 }
 0x48e   :  { %950 = vmatpush.msra.mxu2 %v1709_v1  ;;  %972 = vmatpush.msra.mxu3 %v1744_v9 }
 0x490   :  { %951 = vmatpush.msra.mxu2 %v1718_v3  ;;  %973 = vmatpush.msra.mxu3 %v1751_v10 }
 0x492   :  { %952 = vmatpush.msra.mxu2 %v1726_v5  ;;  %974 = vmatpush.msra.mxu3 %v1769_v13 }
 0x494   :  { %953 = vmatpush.msra.mxu2 %v1739_v8  ;;  %975 = vmatpush.msra.mxu3 %v1774_v14 }
 0x4d4   :  { %v489_v52 = vpop.permute.xlu0 %488 }
 0x4d5   :  { %1459 = vmatmul.msk.f32.gmra.mxu2 %vm186_vm9, %v489_v52  ;;  %1461 = vmatmul.msk.f32.gmra.mxu3 %vm186_vm9, %v489_v52 }
 0x510   :  { %v511_v55 = vpop.f32.mrf.mxu2  ;;  %v533_v56 = vpop.f32.mrf.mxu3 }
 0x511   :  { %v538_v57 = vadd.f32 %v511_v55, %v94_v54 }
 0x513   :  { %1536 = vtanh.f32 %v538_v57  ;;  %v1462_v62 = vmul.f32 -1.442695, %v538_v57 }
 0x519   :  { %v1537_v58 = vpop.eup %1536 }
 0x51a   :  { %584 = vrot.lane.b32.xlu1 %v1537_v58, %s1659_s1 }
 0x558   :  { %v514_v59 = vpop.f32.mrf.mxu2  ;;  %v535_v60 = vpop.f32.mrf.mxu3 }
 0x559   :  { %v539_v61 = vadd.f32 %v535_v60, %v1852_v42 }
 0x55b   :  { %1538 = vtanh.f32 %v539_v61  ;;  %v1463_v20 = vmul.f32 -1.442695, %v539_v61 }
 0x55c   :  { %1540 = vpow2.f32 %v1462_v62 }
 0x561   :  { %v1539_v63 = vpop.eup %1538 }
 0x562   :  { %586 = vrot.lane.b32.xlu2 %v1539_v63, %s1659_s1  ;;  %v1541_v0 = vpop.eup %1540 }
 0x563   :  { %v546_v2 = vadd.f32 1.0, %v1541_v0 }
 0x565   :  { %1542 = vrcp.f32 %v546_v2  ;;  %v559_v12 = vand.u32 2147483648, %v546_v2  ;;  %vm553_vm3 = vweird.f32 %v546_v2  ;;  %v557_v15 = vand.u32 2147483647, %v546_v2 }
 0x566   :  { %1544 = vpow2.f32 %v1463_v20 }
 0x567   :  { %v560_v16 = vor.u32 1.1754944e-38, %v559_v12  ;;  %vm558_vm5 = vcmp.eq.f32.partialorder %v557_v15, 8.507059e+37 }
 0x56b   :  { %v1543_v44 = vpop.eup %1542 }
 0x56c   :  { %v549_v4 = vmul.f32 %v1543_v44, %v546_v2  ;;  %vm554_vm2 = vweird.f32 %v1543_v44  ;;  %v1545_v21 = vpop.eup %1544 }
 0x56d   :  { %vm555_vm4 = vmor %vm553_vm3, %vm554_vm2  ;;  %v547_v22 = vadd.f32 1.0, %v1545_v21 }
 0x56e   :  { %v550_v6 = vsub.f32 1.0, %v549_v4 }
 0x56f   :  { %1546 = vrcp.f32 %v547_v22  ;;  %v574_v32 = vand.u32 2147483648, %v547_v22  ;;  %vm568_vm7 = vweird.f32 %v547_v22  ;;  %v572_v35 = vand.u32 2147483647, %v547_v22 }
 0x570   :  { %v551_v7 = vmul.f32 %v1543_v44, %v550_v6 }
 0x571   :  { %v575_v43 = vor.u32 1.1754944e-38, %v574_v32  ;;  %vm573_vm10 = vcmp.eq.f32.partialorder %v572_v35, 8.507059e+37 }
 0x572   :  { %v552_v11 = vadd.f32 %v1543_v44, %v551_v7 }
 0x574   :  { %v556_v42 = vsel %vm555_vm4, %v1543_v44, %v552_v11 }
 0x575   :  { %v561_v18 = vsel %vm558_vm5, %v560_v16, %v556_v42  ;;  %v1547_v23 = vpop.eup %1546 }
 0x576   :  { %v564_v26 = vmul.f32 %v1547_v23, %v547_v22  ;;  %vm569_vm6 = vweird.f32 %v1547_v23  ;;  %v580_v49 = vmul.f32 %v561_v18, %v1894_v39 }
 0x577   :  { %vm570_vm8 = vmor %vm568_vm7, %vm569_vm6 }
 0x578   :  { %v565_v27 = vsub.f32 1.0, %v564_v26 }
 0x57a   :  { %v566_v30 = vmul.f32 %v1547_v23, %v565_v27 }
 0x57c   :  { %v567_v31 = vadd.f32 %v1547_v23, %v566_v30 }
 0x57e   :  { %v571_v36 = vsel %vm570_vm8, %v1547_v23, %v567_v31 }
 0x57f   :  { %v576_v46 = vsel %vm573_vm10, %v575_v43, %v571_v36 }
 0x580   :  { %v581_v53 = vmul.f32 %v576_v46, %v1899_v47 }
 0x58c   :  { %v585_v17 = vpop.permute.xlu1 %584 }
 0x58d   :  { %v590_v19 = vmul.f32 %v585_v17, %v561_v18 }
 0x58f   :  { %594 = vrot.lane.b32.xlu0 %v590_v19, %s1660_s4 }
 0x5bc   :  { %v587_v45 = vpop.permute.xlu2 %586 }
 0x5bd   :  { %v591_v48 = vmul.f32 %v587_v45, %v576_v46 }
 0x5bf   :  { %596 = vrot.lane.b32.xlu1 %v591_v48, %s1660_s4 }
 0x601   :  { %v595_v50 = vpop.permute.xlu0 %594 }
 0x602   :  { %v1930_v34 = vadd.f32 %v595_v50, %v580_v49 }
 0x604   :  { %1548 = vtanh.f32 %v1930_v34 }
 0x60a   :  { %v1549_v52 = vpop.eup %1548 }
 0x60b   :  { %606 = vrot.lane.b32.xlu2 %v1549_v52, %s1659_s1 }
 0x631   :  { %v597_v54 = vpop.permute.xlu1 %596 }
 0x632   :  { %v1935_v55 = vadd.f32 %v597_v54, %v581_v53 }
 0x634   :  { %1550 = vtanh.f32 %v1935_v55 }
 0x63a   :  { %v1551_v56 = vpop.eup %1550 }
 0x63b   :  { %608 = vrot.lane.b32.xlu0 %v1551_v56, %s1659_s1 }
 0x665   :  { %v607_v57 = vpop.permute.xlu2 %606 }
 0x666   :  { %v1939_v39 = vmul.f32 %v607_v57, %v561_v18 }
 0x668   :  { %638 = vrot.lane.b32.xlu1 %v1939_v39, %s1660_s4 }
 0x6ad   :  { %v609_v58 = vpop.permute.xlu0 %608 }
 0x6ae   :  { %v1943_v59 = vmul.f32 %v609_v58, %v576_v46 }
 0x6b0   :  { %640 = vrot.lane.b32.xlu2 %v1943_v59, %s1660_s4 }
 0x6da   :  { %v639_v47 = vpop.permute.xlu1 %638 }
 0x6db   :  { %1464 = vmatmul.msk.f32.vlgmr.msrb.gmra.mxu2 %vm186_vm9, %v639_v47  ;;  %1466 = vmatmul.msk.f32.vlgmr.msrb.gmra.mxu3 %vm186_vm9, %v639_v47 }
 0x6dc   :  { %1242 = vmatpush.msrb.mxu2 %v1709_v1  ;;  %1264 = vmatpush.msrb.mxu3 %v1744_v9  ;;  %v96_v1 = vpop.f32.mrf.mxu0 }
 0x6dd   :  { %v97_v9 = vadd.f32 %v96_v1, %v1840_v25 }
 0x6de   :  { %1243 = vmatpush.msrb.mxu2 %v1718_v3  ;;  %1265 = vmatpush.msrb.mxu3 %v1751_v10 }
 0x6e0   :  { %1244 = vmatpush.msrb.mxu2 %v1726_v5  ;;  %1266 = vmatpush.msrb.mxu3 %v1769_v13 }
 0x6e2   :  { %1245 = vmatpush.msrb.mxu2 %v1739_v8  ;;  %1267 = vmatpush.msrb.mxu3 %v1774_v14 }
 0x70a   :  { %v641_v60 = vpop.permute.xlu2 %640 }
 0x70b   :  { %1465 = vmatmul.msk.f32.gmra.mxu2 %vm186_vm9, %v641_v60  ;;  %1467 = vmatmul.msk.f32.gmra.mxu3 %vm186_vm9, %v641_v60 }
 0x75e   :  { %v663_v61 = vpop.f32.mrf.mxu2  ;;  %v685_v3 = vpop.f32.mrf.mxu3 }
 0x75f   :  { %v690_v62 = vadd.f32 %v663_v61, %v97_v9  ;;  %v99_v9 = vpop.f32.mrf.mxu0 }
 0x761   :  { %1552 = vtanh.f32 %v690_v62  ;;  %v1468_v63 = vmul.f32 -1.442695, %v690_v62 }
 0x767   :  { %v1553_v10 = vpop.eup %1552  ;;  %v1987_v61 = vpop.f32.mrf.mxu0 }
 0x768   :  { %736 = vrot.lane.b32.xlu0 %v1553_v10, %s1659_s1  ;;  %v100_v10 = vadd.f32 %v99_v9, %v1840_v25 }
 0x76f   :  { %v1989_v3 = vpop.f32.mrf.mxu0 }
 0x777   :  { %v1991_v62 = vpop.f32.mrf.mxu0 }
 0x78e   :  { %v666_v5 = vpop.f32.mrf.mxu2  ;;  %v687_v13 = vpop.f32.mrf.mxu3 }
 0x78f   :  { %v691_v8 = vadd.f32 %v687_v13, %v1850_v40 }
 0x791   :  { %1554 = vtanh.f32 %v691_v8  ;;  %v1469_v19 = vmul.f32 -1.442695, %v691_v8 }
 0x792   :  { %1556 = vpow2.f32 %v1468_v63 }
 0x797   :  { %v1555_v14 = vpop.eup %1554 }
 0x798   :  { %738 = vrot.lane.b32.xlu1 %v1555_v14, %s1659_s1  ;;  %v1557_v0 = vpop.eup %1556 }
 0x799   :  { %v698_v2 = vadd.f32 1.0, %v1557_v0 }
 0x79b   :  { %1558 = vrcp.f32 %v698_v2  ;;  %v711_v12 = vand.u32 2147483648, %v698_v2  ;;  %vm705_vm12 = vweird.f32 %v698_v2  ;;  %v709_v15 = vand.u32 2147483647, %v698_v2 }
 0x79c   :  { %1560 = vpow2.f32 %v1469_v19 }
 0x79d   :  { %v712_v42 = vor.u32 1.1754944e-38, %v711_v12  ;;  %vm710_vm14 = vcmp.eq.f32.partialorder %v709_v15, 8.507059e+37 }
 0x7a1   :  { %v1559_v44 = vpop.eup %1558 }
 0x7a2   :  { %v701_v4 = vmul.f32 %v1559_v44, %v698_v2  ;;  %vm706_vm11 = vweird.f32 %v1559_v44  ;;  %v1561_v20 = vpop.eup %1560 }
 0x7a3   :  { %vm707_vm13 = vmor %vm705_vm12, %vm706_vm11  ;;  %v699_v21 = vadd.f32 1.0, %v1561_v20 }
 0x7a4   :  { %v702_v6 = vsub.f32 1.0, %v701_v4 }
 0x7a5   :  { %1562 = vrcp.f32 %v699_v21  ;;  %v726_v31 = vand.u32 2147483648, %v699_v21  ;;  %vm720_vm0 = vweird.f32 %v699_v21  ;;  %v724_v32 = vand.u32 2147483647, %v699_v21 }
 0x7a6   :  { %v703_v7 = vmul.f32 %v1559_v44, %v702_v6 }
 0x7a7   :  { %v727_v36 = vor.u32 1.1754944e-38, %v726_v31  ;;  %vm725_vm2 = vcmp.eq.f32.partialorder %v724_v32, 8.507059e+37 }
 0x7a8   :  { %v704_v11 = vadd.f32 %v1559_v44, %v703_v7 }
 0x7aa   :  { %v708_v40 = vsel %vm707_vm13, %v1559_v44, %v704_v11 }
 0x7ab   :  { %v713_v17 = vsel %vm710_vm14, %v712_v42, %v708_v40  ;;  %v1563_v22 = vpop.eup %1562 }
 0x7ac   :  { %v716_v23 = vmul.f32 %v1563_v22, %v699_v21  ;;  %vm721_vm15 = vweird.f32 %v1563_v22  ;;  %v732_v48 = vmul.f32 %v713_v17, %v1930_v34 }
 0x7ad   :  { %vm722_vm1 = vmor %vm720_vm0, %vm721_vm15 }
 0x7ae   :  { %v717_v26 = vsub.f32 1.0, %v716_v23 }
 0x7b0   :  { %v718_v27 = vmul.f32 %v1563_v22, %v717_v26 }
 0x7b2   :  { %v719_v30 = vadd.f32 %v1563_v22, %v718_v27 }
 0x7b4   :  { %v723_v35 = vsel %vm722_vm1, %v1563_v22, %v719_v30 }
 0x7b5   :  { %v728_v45 = vsel %vm725_vm2, %v727_v36, %v723_v35 }
 0x7b6   :  { %v733_v53 = vmul.f32 %v728_v45, %v1935_v55 }
 0x7da   :  { %v737_v16 = vpop.permute.xlu0 %736 }
 0x7db   :  { %v742_v18 = vmul.f32 %v737_v16, %v713_v17 }
 0x7dd   :  { %746 = vrot.lane.b32.xlu2 %v742_v18, %s1660_s4 }
 0x80a   :  { %v739_v43 = vpop.permute.xlu1 %738 }
 0x80b   :  { %v743_v46 = vmul.f32 %v739_v43, %v728_v45 }
 0x80d   :  { %748 = vrot.lane.b32.xlu0 %v743_v46, %s1660_s4 }
 0x837   :  { %v747_v49 = vpop.permute.xlu2 %746 }
 0x838   :  { %v1966_v50 = vadd.f32 %v747_v49, %v732_v48 }
 0x83a   :  { %1564 = vtanh.f32 %v1966_v50 }
 0x840   :  { %v1565_v52 = vpop.eup %1564 }
 0x841   :  { %758 = vrot.lane.b32.xlu1 %v1565_v52, %s1659_s1 }
 0x87f   :  { %v749_v54 = vpop.permute.xlu0 %748 }
 0x880   :  { %v1971_v56 = vadd.f32 %v749_v54, %v733_v53 }
 0x882   :  { %1566 = vtanh.f32 %v1971_v56 }
 0x888   :  { %v1567_v57 = vpop.eup %1566 }
 0x889   :  { %760 = vrot.lane.b32.xlu2 %v1567_v57, %s1659_s1 }
 0x8b3   :  { %v759_v58 = vpop.permute.xlu1 %758 }
 0x8b4   :  { %v1975_v34 = vmul.f32 %v759_v58, %v713_v17 }
 0x8b6   :  { %784 = vrot.lane.b32.xlu0 %v1975_v34, %s1660_s4 }
 0x8e3   :  { %v761_v47 = vpop.permute.xlu2 %760 }
 0x8e4   :  { %v1979_v60 = vmul.f32 %v761_v47, %v728_v45 }
 0x8e6   :  { %786 = vrot.lane.b32.xlu1 %v1979_v60, %s1660_s4 }
 0x928   :  { %v785_v55 = vpop.permute.xlu0 %784 }
 0x929   :  { %1470 = vmatmul.msk.f32.vlgmr.msrb.gmra.mxu0 %vm186_vm9, %v785_v55  ;;  %1472 = vmatmul.msk.f32.vlgmr.msrb.gmra.mxu1 %vm186_vm9, %v785_v55 }
 0x958   :  { %v787_v1 = vpop.permute.xlu1 %786 }
 0x959   :  { %1471 = vmatmul.msk.f32.gmra.mxu0 %vm186_vm9, %v787_v1  ;;  %1473 = vmatmul.msk.f32.gmra.mxu1 %vm186_vm9, %v787_v1 }
 0x9a6   :  { %v809_v5 = vpop.f32.mrf.mxu0  ;;  %v831_v13 = vpop.f32.mrf.mxu1 }
 0x9a7   :  { %v836_v8 = vadd.f32 %v809_v5, %v100_v10 }
 0x9a9   :  { %1568 = vtanh.f32 %v836_v8  ;;  %v1474_v44 = vmul.f32 -1.442695, %v836_v8 }
 0x9af   :  { %v1569_v14 = vpop.eup %1568 }
 0x9b0   :  { %882 = vrot.lane.b32.xlu2 %v1569_v14, %s1659_s1  ;;  %v103_v14 = vadd.f32 %v1987_v61, %v1840_v25 }
 0x9d6   :  { %v812_v63 = vpop.f32.mrf.mxu0  ;;  %v833_v0 = vpop.f32.mrf.mxu1 }
 0x9d7   :  { %v837_v2 = vadd.f32 %v833_v0, %v1848_v38 }
 0x9d9   :  { %1570 = vtanh.f32 %v837_v2  ;;  %v1475_v22 = vmul.f32 -1.442695, %v837_v2 }
 0x9da   :  { %1572 = vpow2.f32 %v1474_v44 }
 0x9df   :  { %v1571_v4 = vpop.eup %1570 }
 0x9e0   :  { %884 = vrot.lane.b32.xlu0 %v1571_v4, %s1659_s1  ;;  %v1573_v6 = vpop.eup %1572 }
 0x9e1   :  { %v844_v7 = vadd.f32 1.0, %v1573_v6 }
 0x9e3   :  { %1574 = vrcp.f32 %v844_v7  ;;  %v857_v16 = vand.u32 2147483648, %v844_v7  ;;  %vm851_vm4 = vweird.f32 %v844_v7  ;;  %v855_v17 = vand.u32 2147483647, %v844_v7 }
 0x9e4   :  { %1576 = vpow2.f32 %v1475_v22 }
 0x9e5   :  { %v858_v18 = vor.u32 1.1754944e-38, %v857_v16  ;;  %vm856_vm6 = vcmp.eq.f32.partialorder %v855_v17, 8.507059e+37 }
 0x9e9   :  { %v1575_v11 = vpop.eup %1574 }
 0x9ea   :  { %v847_v12 = vmul.f32 %v1575_v11, %v844_v7  ;;  %vm852_vm3 = vweird.f32 %v1575_v11  ;;  %v1577_v23 = vpop.eup %1576 }
 0x9eb   :  { %vm853_vm5 = vmor %vm851_vm4, %vm852_vm3  ;;  %v845_v26 = vadd.f32 1.0, %v1577_v23 }
 0x9ec   :  { %v848_v15 = vsub.f32 1.0, %v847_v12 }
 0x9ed   :  { %1578 = vrcp.f32 %v845_v26  ;;  %v872_v36 = vand.u32 2147483648, %v845_v26  ;;  %vm866_vm8 = vweird.f32 %v845_v26  ;;  %v870_v43 = vand.u32 2147483647, %v845_v26 }
 0x9ee   :  { %v849_v40 = vmul.f32 %v1575_v11, %v848_v15 }
 0x9ef   :  { %v873_v46 = vor.u32 1.1754944e-38, %v872_v36  ;;  %vm871_vm11 = vcmp.eq.f32.partialorder %v870_v43, 8.507059e+37 }
 0x9f0   :  { %v850_v42 = vadd.f32 %v1575_v11, %v849_v40 }
 0x9f2   :  { %v854_v38 = vsel %vm853_vm5, %v1575_v11, %v850_v42 }
 0x9f3   :  { %v859_v20 = vsel %vm856_vm6, %v858_v18, %v854_v38  ;;  %v1579_v27 = vpop.eup %1578 }
 0x9f4   :  { %v862_v30 = vmul.f32 %v1579_v27, %v845_v26  ;;  %vm867_vm7 = vweird.f32 %v1579_v27  ;;  %v878_v53 = vmul.f32 %v859_v20, %v1966_v50 }
 0x9f5   :  { %vm868_vm10 = vmor %vm866_vm8, %vm867_vm7 }
 0x9f6   :  { %v863_v31 = vsub.f32 1.0, %v862_v30 }
 0x9f8   :  { %v864_v32 = vmul.f32 %v1579_v27, %v863_v31 }
 0x9fa   :  { %v865_v35 = vadd.f32 %v1579_v27, %v864_v32 }
 0x9fc   :  { %v869_v45 = vsel %vm868_vm10, %v1579_v27, %v865_v35 }
 0x9fd   :  { %v874_v49 = vsel %vm871_vm11, %v873_v46, %v869_v45 }
 0x9fe   :  { %v879_v47 = vmul.f32 %v874_v49, %v1971_v56 }
 0xa0a   :  { %v883_v19 = vpop.permute.xlu2 %882 }
 0xa0b   :  { %v888_v21 = vmul.f32 %v883_v19, %v859_v20 }
 0xa0d   :  { %892 = vrot.lane.b32.xlu1 %v888_v21, %s1660_s4 }
 0xa52   :  { %v885_v48 = vpop.permute.xlu0 %884 }
 0xa53   :  { %v889_v52 = vmul.f32 %v885_v48, %v874_v49 }
 0xa55   :  { %894 = vrot.lane.b32.xlu2 %v889_v52, %s1660_s4 }
 0xa7f   :  { %v893_v54 = vpop.permute.xlu1 %892 }
 0xa80   :  { %v2000_v57 = vadd.f32 %v893_v54, %v878_v53 }
 0xa82   :  { %1580 = vtanh.f32 %v2000_v57 }
 0xa88   :  { %v1581_v58 = vpop.eup %1580 }
 0xa89   :  { %904 = vrot.lane.b32.xlu0 %v1581_v58, %s1659_s1 }
 0xaaf   :  { %v895_v55 = vpop.permute.xlu2 %894 }
 0xab0   :  { %v2005_v1 = vadd.f32 %v895_v55, %v879_v47 }
 0xab2   :  { %1582 = vtanh.f32 %v2005_v1 }
 0xab8   :  { %v1583_v9 = vpop.eup %1582 }
 0xab9   :  { %906 = vrot.lane.b32.xlu1 %v1583_v9, %s1659_s1 }
 0xafb   :  { %v905_v10 = vpop.permute.xlu0 %904 }
 0xafc   :  { %v2009_v50 = vmul.f32 %v905_v10, %v859_v20 }
 0xafe   :  { %930 = vrot.lane.b32.xlu2 %v2009_v50, %s1660_s4 }
 0xb2b   :  { %v907_v5 = vpop.permute.xlu1 %906 }
 0xb2c   :  { %v2013_v13 = vmul.f32 %v907_v5, %v874_v49 }
 0xb2e   :  { %932 = vrot.lane.b32.xlu0 %v2013_v13, %s1660_s4 }
 0xb58   :  { %v931_v56 = vpop.permute.xlu2 %930 }
 0xb59   :  { %1476 = vmatmul.msk.f32.vlgmr.msra.gmra.mxu2 %vm186_vm9, %v931_v56  ;;  %1478 = vmatmul.msk.f32.vlgmr.msra.gmra.mxu3 %vm186_vm9, %v931_v56 }
 0xba0   :  { %v933_v8 = vpop.permute.xlu0 %932 }
 0xba1   :  { %1477 = vmatmul.msk.f32.gmra.mxu2 %vm186_vm9, %v933_v8  ;;  %1479 = vmatmul.msk.f32.gmra.mxu3 %vm186_vm9, %v933_v8 }
 0xbdc   :  { %v955_v63 = vpop.f32.mrf.mxu2  ;;  %v977_v0 = vpop.f32.mrf.mxu3 }
 0xbdd   :  { %v982_v2 = vadd.f32 %v955_v63, %v103_v14 }
 0xbdf   :  { %1584 = vtanh.f32 %v982_v2  ;;  %v1480_v11 = vmul.f32 -1.442695, %v982_v2 }
 0xbe5   :  { %v1585_v44 = vpop.eup %1584 }
 0xbe6   :  { %1028 = vrot.lane.b32.xlu1 %v1585_v44, %s1659_s1  ;;  %v106_v44 = vadd.f32 %v1989_v3, %v1840_v25 }
 0xc24   :  { %v958_v4 = vpop.f32.mrf.mxu2  ;;  %v979_v6 = vpop.f32.mrf.mxu3 }
 0xc25   :  { %v983_v7 = vadd.f32 %v979_v6, %v1845_v33 }
 0xc27   :  { %1586 = vtanh.f32 %v983_v7  ;;  %v1481_v26 = vmul.f32 -1.442695, %v983_v7 }
 0xc28   :  { %1588 = vpow2.f32 %v1480_v11 }
 0xc2d   :  { %v1587_v12 = vpop.eup %1586 }
 0xc2e   :  { %1030 = vrot.lane.b32.xlu2 %v1587_v12, %s1659_s1  ;;  %v1589_v15 = vpop.eup %1588 }
 0xc2f   :  { %v990_v40 = vadd.f32 1.0, %v1589_v15 }
 0xc31   :  { %1590 = vrcp.f32 %v990_v40  ;;  %v1003_v18 = vand.u32 2147483648, %v990_v40  ;;  %vm997_vm13 = vweird.f32 %v990_v40  ;;  %v1001_v19 = vand.u32 2147483647, %v990_v40 }
 0xc32   :  { %1592 = vpow2.f32 %v1481_v26 }
 0xc33   :  { %v1004_v20 = vor.u32 1.1754944e-38, %v1003_v18  ;;  %vm1002_vm15 = vcmp.eq.f32.partialorder %v1001_v19, 8.507059e+37 }
 0xc37   :  { %v1591_v61 = vpop.eup %1590 }
 0xc38   :  { %v993_v42 = vmul.f32 %v1591_v61, %v990_v40  ;;  %vm998_vm12 = vweird.f32 %v1591_v61  ;;  %v1593_v27 = vpop.eup %1592 }
 0xc39   :  { %vm999_vm14 = vmor %vm997_vm13, %vm998_vm12  ;;  %v991_v30 = vadd.f32 1.0, %v1593_v27 }
 0xc3a   :  { %v994_v16 = vsub.f32 1.0, %v993_v42 }
 0xc3b   :  { %1594 = vrcp.f32 %v991_v30  ;;  %v1018_v45 = vand.u32 2147483648, %v991_v30  ;;  %vm1012_vm1 = vweird.f32 %v991_v30  ;;  %v1016_v46 = vand.u32 2147483647, %v991_v30 }
 0xc3c   :  { %v995_v17 = vmul.f32 %v1591_v61, %v994_v16 }
 0xc3d   :  { %v1019_v49 = vor.u32 1.1754944e-38, %v1018_v45  ;;  %vm1017_vm3 = vcmp.eq.f32.partialorder %v1016_v46, 8.507059e+37 }
 0xc3e   :  { %v996_v38 = vadd.f32 %v1591_v61, %v995_v17 }
 0xc40   :  { %v1000_v33 = vsel %vm999_vm14, %v1591_v61, %v996_v38 }
 0xc41   :  { %v1005_v22 = vsel %vm1002_vm15, %v1004_v20, %v1000_v33  ;;  %v1595_v31 = vpop.eup %1594 }
 0xc42   :  { %v1008_v32 = vmul.f32 %v1595_v31, %v991_v30  ;;  %vm1013_vm0 = vweird.f32 %v1595_v31  ;;  %v1024_v58 = vmul.f32 %v1005_v22, %v2000_v57 }
 0xc43   :  { %vm1014_vm2 = vmor %vm1012_vm1, %vm1013_vm0 }
 0xc44   :  { %v1009_v35 = vsub.f32 1.0, %v1008_v32 }
 0xc46   :  { %v1010_v36 = vmul.f32 %v1595_v31, %v1009_v35 }
 0xc48   :  { %v1011_v43 = vadd.f32 %v1595_v31, %v1010_v36 }
 0xc4a   :  { %v1015_v48 = vsel %vm1014_vm2, %v1595_v31, %v1011_v43 }
 0xc4b   :  { %v1020_v53 = vsel %vm1017_vm3, %v1019_v49, %v1015_v48 }
 0xc4c   :  { %v1025_v10 = vmul.f32 %v1020_v53, %v2005_v1 }
 0xc58   :  { %v1029_v21 = vpop.permute.xlu1 %1028 }
 0xc59   :  { %v1034_v23 = vmul.f32 %v1029_v21, %v1005_v22 }
 0xc5b   :  { %1038 = vrot.lane.b32.xlu0 %v1034_v23, %s1660_s4 }
 0xc88   :  { %v1031_v52 = vpop.permute.xlu2 %1030 }
 0xc89   :  { %v1035_v54 = vmul.f32 %v1031_v52, %v1020_v53 }
 0xc8b   :  { %1040 = vrot.lane.b32.xlu1 %v1035_v54, %s1660_s4 }
 0xccd   :  { %v1039_v47 = vpop.permute.xlu0 %1038 }
 0xcce   :  { %v2029_v55 = vadd.f32 %v1039_v47, %v1024_v58 }
 0xcd0   :  { %1596 = vtanh.f32 %v2029_v55 }
 0xcd6   :  { %v1597_v9 = vpop.eup %1596 }
 0xcd7   :  { %1050 = vrot.lane.b32.xlu2 %v1597_v9, %s1659_s1 }
 0xcfd   :  { %v1041_v5 = vpop.permute.xlu1 %1040 }
 0xcfe   :  { %v2034_v56 = vadd.f32 %v1041_v5, %v1025_v10 }
 0xd00   :  { %1598 = vtanh.f32 %v2034_v56 }
 0xd06   :  { %v1599_v8 = vpop.eup %1598 }
 0xd07   :  { %1052 = vrot.lane.b32.xlu0 %v1599_v8, %s1659_s1 }
 0xd31   :  { %v1051_v14 = vpop.permute.xlu2 %1050 }
 0xd32   :  { %v2038_v57 = vmul.f32 %v1051_v14, %v1005_v22 }
 0xd34   :  { %1076 = vrot.lane.b32.xlu1 %v2038_v57, %s1660_s4 }
 0xd79   :  { %v1053_v63 = vpop.permute.xlu0 %1052 }
 0xd7a   :  { %v2042_v0 = vmul.f32 %v1053_v63, %v1020_v53 }
 0xd7c   :  { %1078 = vrot.lane.b32.xlu2 %v2042_v0, %s1660_s4 }
 0xda6   :  { %v1077_v1 = vpop.permute.xlu1 %1076 }
 0xda7   :  { %1482 = vmatmul.msk.f32.vlgmr.msra.gmra.mxu0 %vm186_vm9, %v1077_v1  ;;  %1484 = vmatmul.msk.f32.vlgmr.msra.gmra.mxu1 %vm186_vm9, %v1077_v1 }
 0xdd6   :  { %v1079_v2 = vpop.permute.xlu2 %1078 }
 0xdd7   :  { %1483 = vmatmul.msk.f32.gmra.mxu0 %vm186_vm9, %v1079_v2  ;;  %1485 = vmatmul.msk.f32.gmra.mxu1 %vm186_vm9, %v1079_v2 }
 0xe24   :  { %v1101_v4 = vpop.f32.mrf.mxu0  ;;  %v1123_v6 = vpop.f32.mrf.mxu1 }
 0xe25   :  { %v1128_v7 = vadd.f32 %v1101_v4, %v106_v44 }
 0xe27   :  { %1600 = vtanh.f32 %v1128_v7  ;;  %v1486_v42 = vmul.f32 -1.442695, %v1128_v7 }
 0xe2d   :  { %v1601_v11 = vpop.eup %1600 }
 0xe2e   :  { %1174 = vrot.lane.b32.xlu0 %v1601_v11, %s1659_s1  ;;  %v109_v11 = vadd.f32 %v1991_v62, %v1840_v25 }
 0xe54   :  { %v1104_v12 = vpop.f32.mrf.mxu0  ;;  %v1125_v15 = vpop.f32.mrf.mxu1 }
 0xe55   :  { %v1129_v40 = vadd.f32 %v1125_v15, %v1843_v29 }
 0xe57   :  { %1602 = vtanh.f32 %v1129_v40  ;;  %v1487_v30 = vmul.f32 -1.442695, %v1129_v40 }
 0xe58   :  { %1604 = vpow2.f32 %v1486_v42  ;;  %v1661_v42 = vmov 0  }
 0xe59   :  { %1500 = vset.pattern.permute.xlu0 %v1661_v42  ;;  %1501 = vset.pattern.permute.xlu1 %v1661_v42 }
 0xe5a   :  { %1502 = vset.pattern.permute.xlu2 %v1661_v42 }
 0xe5d   :  { %v1603_v61 = vpop.eup %1602 }
 0xe5e   :  { %1176 = vrot.lane.b32.xlu1 %v1603_v61, %s1659_s1  ;;  %v1605_v16 = vpop.eup %1604 }
 0xe5f   :  { %v1136_v17 = vadd.f32 1.0, %v1605_v16 }
 0xe61   :  { %1606 = vrcp.f32 %v1136_v17  ;;  %v1149_v20 = vand.u32 2147483648, %v1136_v17  ;;  %vm1143_vm5 = vweird.f32 %v1136_v17  ;;  %v1147_v21 = vand.u32 2147483647, %v1136_v17 }
 0xe62   :  { %1608 = vpow2.f32 %v1487_v30 }
 0xe63   :  { %v1150_v22 = vor.u32 1.1754944e-38, %v1149_v20  ;;  %vm1148_vm7 = vcmp.eq.f32.partialorder %v1147_v21, 8.507059e+37 }
 0xe67   :  { %v1607_v3 = vpop.eup %1606 }
 0xe68   :  { %v1139_v38 = vmul.f32 %v1607_v3, %v1136_v17  ;;  %vm1144_vm4 = vweird.f32 %v1607_v3  ;;  %v1609_v31 = vpop.eup %1608 }
 0xe69   :  { %vm1145_vm6 = vmor %vm1143_vm5, %vm1144_vm4  ;;  %v1137_v32 = vadd.f32 1.0, %v1609_v31 }
 0xe6a   :  { %v1140_v18 = vsub.f32 1.0, %v1139_v38  ;;  %v2089_v38 = vld [vmem:[%s2192_s0] sm:$0xff] }
 0xe6b   :  { %1610 = vrcp.f32 %v1137_v32  ;;  %v1164_v48 = vand.u32 2147483648, %v1137_v32  ;;  %vm1158_vm10 = vweird.f32 %v1137_v32  ;;  %v1162_v49 = vand.u32 2147483647, %v1137_v32 }
 0xe6c   :  { %v1141_v19 = vmul.f32 %v1607_v3, %v1140_v18  ;;  %vm310_vm13 = vcmp.eq.s32.totalorder %v2089_v38, 0  ;;  %vm912_vm1 = vcmp.eq.s32.totalorder %v2089_v38, 4 }
 0xe6d   :  { %v1165_v53 = vor.u32 1.1754944e-38, %v1164_v48  ;;  %vm1163_vm12 = vcmp.eq.f32.partialorder %v1162_v49, 8.507059e+37  ;;  %v312_v18 = vsel %vm310_vm13, 1, %v1661_v42  ;;  %v914_v31 = vsel %vm912_vm1, 1, %v1661_v42 }
 0xe6e   :  { %v1142_v33 = vadd.f32 %v1607_v3, %v1141_v19 }
 0xe70   :  { %v1146_v29 = vsel %vm1145_vm6, %v1607_v3, %v1142_v33  ;;  %vm766_vm6 = vcmp.eq.s32.totalorder %v2089_v38, 3 }
 0xe71   :  { %v1151_v26 = vsel %vm1148_vm7, %v1150_v22, %v1146_v29  ;;  %v1611_v35 = vpop.eup %1610  ;;  %v2097_v29 = vld [vmem:[%s2192_s0 + $0x8] sm:$0xff]  ;;  %v768_v49 = vsel %vm766_vm6, 1, %v1661_v42 }
 0xe72   :  { %v1154_v36 = vmul.f32 %v1611_v35, %v1137_v32  ;;  %vm1159_vm8 = vweird.f32 %v1611_v35  ;;  %v1170_v9 = vmul.f32 %v1151_v26, %v2029_v55  ;;  %vm615_vm14 = vcmp.eq.s32.totalorder %v2097_v29, 2 }
 0xe73   :  { %vm1160_vm11 = vmor %vm1158_vm10, %vm1159_vm8  ;;  %v617_v22 = vsel %vm615_vm14, 1, %v1661_v42  ;;  %vm311_vm4 = vcmp.eq.s32.totalorder %v2097_v29, 0  ;;  %vm463_vm5 = vcmp.eq.s32.totalorder %v2097_v29, 1  ;;  %vm913_vm7 = vcmp.eq.s32.totalorder %v2097_v29, 4 }
 0xe74   :  { %v1155_v43 = vsub.f32 1.0, %v1154_v36  ;;  %v465_v48 = vsel %vm463_vm5, 1, %v1661_v42  ;;  %vm1059_vm8 = vcmp.eq.s32.totalorder %v2097_v29, 5  ;;  %vm1204_vm10 = vcmp.eq.s32.totalorder %v2089_v38, 6 }
 0xe75   :  { %vm767_vm1 = vcmp.eq.s32.totalorder %v2097_v29, 3  ;;  %vm1351_vm5 = vcmp.eq.s32.totalorder %v2097_v29, 7 }
 0xe76   :  { %v1156_v45 = vmul.f32 %v1611_v35, %v1155_v43 }
 0xe78   :  { %v1157_v46 = vadd.f32 %v1611_v35, %v1156_v45 }
 0xe7a   :  { %v1161_v52 = vsel %vm1160_vm11, %v1611_v35, %v1157_v46  ;;  %v313_v46 = vsel %vm311_vm4, 1, %v1661_v42  ;;  %vm1350_vm4 = vcmp.eq.s32.totalorder %v2089_v38, 7 }
 0xe7b   :  { %v1166_v58 = vsel %vm1163_vm12, %v1165_v53, %v1161_v52 }
 0xe7c   :  { %v1171_v14 = vmul.f32 %v1166_v58, %v2034_v56 }
 0xea0   :  { %v1175_v23 = vpop.permute.xlu0 %1174 }
 0xea1   :  { %v1180_v27 = vmul.f32 %v1175_v23, %v1151_v26 }
 0xea3   :  { %1184 = vrot.lane.b32.xlu2 %v1180_v27, %s1660_s4 }
 0xed0   :  { %v1177_v54 = vpop.permute.xlu1 %1176 }
 0xed1   :  { %v1181_v47 = vmul.f32 %v1177_v54, %v1166_v58 }
 0xed3   :  { %1186 = vrot.lane.b32.xlu0 %v1181_v47, %s1660_s4  ;;  %v1061_v47 = vsel %vm1059_vm8, 1, %v1661_v42 }
 0xefd   :  { %v1185_v10 = vpop.permute.xlu2 %1184 }
 0xefe   :  { %v2058_v5 = vadd.f32 %v1185_v10, %v1170_v9  ;;  %v1206_v10 = vsel %vm1204_vm10, 1, %v1661_v42 }
 0xf00   :  { %1612 = vtanh.f32 %v2058_v5 }
 0xf06   :  { %v1613_v8 = vpop.eup %1612 }
 0xf07   :  { %1196 = vrot.lane.b32.xlu1 %v1613_v8, %s1659_s1 }
 0xf45   :  { %v1187_v63 = vpop.permute.xlu0 %1186 }
 0xf46   :  { %v2063_v1 = vadd.f32 %v1187_v63, %v1171_v14 }
 0xf48   :  { %1614 = vtanh.f32 %v2063_v1 }
 0xf4e   :  { %v1615_v2 = vpop.eup %1614 }
 0xf4f   :  { %1198 = vrot.lane.b32.xlu2 %v1615_v2, %s1659_s1 }
 0xf79   :  { %v1197_v44 = vpop.permute.xlu1 %1196 }
 0xf7a   :  { %v2067_v55 = vmul.f32 %v1197_v44, %v1151_v26 }
 0xf7c   :  { %1222 = vrot.lane.b32.xlu0 %v2067_v55, %s1660_s4 }
 0xfa9   :  { %v1199_v4 = vpop.permute.xlu2 %1198 }
 0xfaa   :  { %v2071_v6 = vmul.f32 %v1199_v4, %v1166_v58  ;;  %v915_v58 = vsel %vm913_vm7, 1, %v1661_v42 }
 0xfac   :  { %1224 = vrot.lane.b32.xlu1 %v2071_v6, %s1660_s4 }
 0xfee   :  { %v1223_v56 = vpop.permute.xlu0 %1222 }
 0xfef   :  { %1488 = vmatmul.msk.f32.vlgmr.msrb.gmra.mxu2 %vm186_vm9, %v1223_v56  ;;  %1490 = vmatmul.msk.f32.vlgmr.msrb.gmra.mxu3 %vm186_vm9, %v1223_v56 }
0x101e   :  { %v1225_v7 = vpop.permute.xlu1 %1224 }
0x101f   :  { %1489 = vmatmul.msk.f32.gmra.mxu2 %vm186_vm9, %v1225_v7  ;;  %1491 = vmatmul.msk.f32.gmra.mxu3 %vm186_vm9, %v1225_v7 }
0x1072   :  { %v1247_v12 = vpop.f32.mrf.mxu2  ;;  %v1269_v15 = vpop.f32.mrf.mxu3 }
0x1073   :  { %v1274_v40 = vadd.f32 %v1247_v12, %v109_v11 }
0x1075   :  { %1616 = vtanh.f32 %v1274_v40  ;;  %v1492_v25 = vmul.f32 -1.442695, %v1274_v40 }
0x107b   :  { %v1617_v61 = vpop.eup %1616 }
0x107c   :  { %1320 = vrot.lane.b32.xlu2 %v1617_v61, %s1659_s1 }
0x10a2   :  { %v1250_v16 = vpop.f32.mrf.mxu2  ;;  %v1271_v17 = vpop.f32.mrf.mxu3 }
0x10a3   :  { %v1275_v3 = vadd.f32 %v1271_v17, %v1838_v24  ;;  %v769_v16 = vsel %vm767_vm1, 1, %v1661_v42 }
0x10a5   :  { %1618 = vtanh.f32 %v1275_v3  ;;  %v1493_v52 = vmul.f32 -1.442695, %v1275_v3 }
0x10a6   :  { %1620 = vpow2.f32 %v1492_v25 }
0x10ab   :  { %v1619_v62 = vpop.eup %1618 }
0x10ac   :  { %1322 = vrot.lane.b32.xlu0 %v1619_v62, %s1659_s1  ;;  %v1621_v19 = vpop.eup %1620 }
0x10ad   :  { %v1282_v33 = vadd.f32 1.0, %v1621_v19  ;;  %v1352_v19 = vsel %vm1350_vm4, 1, %v1661_v42 }
0x10af   :  { %1622 = vrcp.f32 %v1282_v33  ;;  %v1295_v27 = vand.u32 2147483648, %v1282_v33  ;;  %vm1289_vm0 = vweird.f32 %v1282_v33  ;;  %v1293_v30 = vand.u32 2147483647, %v1282_v33 }
0x10b0   :  { %1624 = vpow2.f32 %v1493_v52 }
0x10b1   :  { %v1296_v35 = vor.u32 1.1754944e-38, %v1295_v27  ;;  %vm1294_vm3 = vcmp.eq.f32.partialorder %v1293_v30, 8.507059e+37 }
0x10b4   :  { %315 = vperm.xlu0 %1500, %v312_v18  }
0x10b5   :  { %v1623_v24 = vpop.eup %1622 }
0x10b6   :  { %v1285_v20 = vmul.f32 %v1623_v24, %v1282_v33  ;;  %vm1290_vm15 = vweird.f32 %v1623_v24  ;;  %v1625_v53 = vpop.eup %1624 }
0x10b7   :  { %vm1291_vm2 = vmor %vm1289_vm0, %vm1290_vm15  ;;  %v1283_v54 = vadd.f32 1.0, %v1625_v53  ;;  %vm462_vm15 = vcmp.eq.s32.totalorder %v2089_v38, 1  ;;  %vm614_vm0 = vcmp.eq.s32.totalorder %v2089_v38, 2 }
0x10b8   :  { %v1286_v21 = vsub.f32 1.0, %v1285_v20  ;;  %v464_v40 = vsel %vm462_vm15, 1, %v1661_v42  ;;  %v616_v61 = vsel %vm614_vm0, 1, %v1661_v42 }
0x10b9   :  { %1626 = vrcp.f32 %v1283_v54  ;;  %v1310_v44 = vand.u32 2147483648, %v1283_v54  ;;  %vm1304_vm12 = vweird.f32 %v1283_v54  ;;  %v1308_v4 = vand.u32 2147483647, %v1283_v54 }
0x10ba   :  { %v1287_v23 = vmul.f32 %v1623_v24, %v1286_v21 }
0x10bb   :  { %v1311_v7 = vor.u32 1.1754944e-38, %v1310_v44  ;;  %vm1309_vm14 = vcmp.eq.f32.partialorder %v1308_v4, 8.507059e+37  ;;  %v1374_v44 = vld [vmem:[%s2197_s5 + $0x8] sm:$0xff]  ;;  %v1373_v4 = vld [vmem:[%s2197_s5] sm:$0xff] }
0x10bc   :  { %622 = vperm.xlu0 %1500, %v617_v22   ;;  %v1288_v26 = vadd.f32 %v1623_v24, %v1287_v23  ;;  %v1353_v22 = vsel %vm1351_vm5, 1, %v1661_v42 }
0x10be   :  { %v1292_v32 = vsel %vm1291_vm2, %v1623_v24, %v1288_v26  ;;  %vm1058_vm2 = vcmp.eq.s32.totalorder %v2089_v38, 5 }
0x10bf   :  { %v2103_v43 = vsel %vm1294_vm3, %v1296_v35, %v1292_v32  ;;  %v1627_v9 = vpop.eup %1626  ;;  %v1060_v17 = vsel %vm1058_vm2, 1, %v1661_v42  ;;  %vm1205_vm3 = vcmp.eq.s32.totalorder %v2097_v29, 6 }
0x10c0   :  { %v1300_v8 = vmul.f32 %v1627_v9, %v1283_v54  ;;  %vm1305_vm11 = vweird.f32 %v1627_v9  ;;  %v1207_v3 = vsel %vm1205_vm3, 1, %v1661_v42  ;;  %v1316_v25 = vmul.f32 %v2103_v43, %v2058_v5 }
0x10c1   :  { %vm1306_vm13 = vmor %vm1304_vm12, %vm1305_vm11 }
0x10c2   :  { %v1301_v14 = vsub.f32 1.0, %v1300_v8 }
0x10c4   :  { %917 = vperm.xlu0 %1500, %v914_v31   ;;  %v1302_v63 = vmul.f32 %v1627_v9, %v1301_v14 }
0x10c6   :  { %v1303_v2 = vadd.f32 %v1627_v9, %v1302_v63  ;;  %v1376_v63 = vld [vmem:[%s2197_s5 + $0x18] sm:$0xff] }
0x10c8   :  { %v1307_v56 = vsel %vm1306_vm13, %v1627_v9, %v1303_v2  ;;  %v1375_v2 = vld [vmem:[%s2197_s5 + $0x10] sm:$0xff] }
0x10c9   :  { %v2119_v12 = vsel %vm1309_vm14, %v1311_v7, %v1307_v56 }
0x10ca   :  { %v1317_v27 = vmul.f32 %v2119_v12, %v2063_v1 }
0x10cc   :  { %1066 = vperm.xlu0 %1500, %v1061_v47  }
0x10d6   :  { %v1321_v36 = vpop.permute.xlu2 %1320 }
0x10d7   :  { %v1326_v45 = vmul.f32 %v1321_v36, %v2103_v43 }
0x10d9   :  { %1330 = vrot.lane.b32.xlu1 %v1326_v45, %s1660_s4 }
0x10e1   :  { %318 = vperm.xlu1 %1501, %v313_v46  }
0x10e9   :  { %470 = vperm.xlu1 %1501, %v465_v48  }
0x10f1   :  { %771 = vperm.xlu1 %1501, %v768_v49  }
0x10f9   :  { %920 = vperm.xlu1 %1501, %v915_v58  }
0x1101   :  { %1209 = vperm.xlu1 %1501, %v1206_v10  }
0x111e   :  { %v1323_v11 = vpop.permute.xlu0 %1322 }
0x111f   :  { %v1327_v15 = vmul.f32 %v1323_v11, %v2119_v12 }
0x1121   :  { %1332 = vrot.lane.b32.xlu2 %v1327_v15, %s1660_s4 }
0x1126   :  { %v316_v33 = vpop.permute.xlu0 %315 }
0x1127   :  { %vm320_vm11 = vcmp.eq.s32.totalorder %v316_v33, 1 }
0x1129   :  { %467 = vperm.xlu2 %1502, %v464_v40  }
0x112e   :  { %v623_v21 = vpop.permute.xlu0 %622 }
0x112f   :  { %vm625_vm7 = vcmp.eq.s32.totalorder %v623_v21, 1 }
0x1131   :  { %619 = vperm.xlu2 %1502, %v616_v61  }
0x1136   :  { %v918_v45 = vpop.permute.xlu0 %917 }
0x1137   :  { %vm922_vm15 = vcmp.eq.s32.totalorder %v918_v45, 1 }
0x1139   :  { %774 = vperm.xlu2 %1502, %v769_v16  }
0x113e   :  { %v1067_v52 = vpop.permute.xlu0 %1066 }
0x113f   :  { %vm1069_vm4 = vcmp.eq.s32.totalorder %v1067_v52, 1 }
0x1141   :  { %1063 = vperm.xlu2 %1502, %v1060_v17  }
0x1149   :  { %1212 = vperm.xlu2 %1502, %v1207_v3  }
0x114b   :  { %v1331_v62 = vpop.permute.xlu1 %1330 }
0x114c   :  { %v1336_v18 = vadd.f32 %v1331_v62, %v1316_v25 }
0x114e   :  { %1628 = vtanh.f32 %v1336_v18 }
0x1151   :  { %1355 = vperm.xlu2 %1502, %v1352_v19  }
0x1153   :  { %v319_v24 = vpop.permute.xlu1 %318 }
0x1154   :  { %v1629_v20 = vpop.eup %1628  ;;  %vm321_vm6 = vcmp.eq.s32.totalorder %v319_v24, 1 }
0x1155   :  { %1342 = vrot.lane.b32.xlu0 %v1629_v20, %s1659_s1  ;;  %v323_v38 = vsel %vm321_vm6, %v1871_v41, 0.0 }
0x115b   :  { %v471_v5 = vpop.permute.xlu1 %470 }
0x115c   :  { %vm473_vm8 = vcmp.eq.s32.totalorder %v471_v5, 1 }
0x115d   :  { %v475_v23 = vsel %vm473_vm8, %v1907_v51, %v323_v38  ;;  %1358 = vperm.xlu0 %1500, %v1353_v22   ;;  %vm1409_vm8 = vcmask 64512  }
0x115e   :  { %v627_v26 = vsel %vm625_vm7, %v1943_v59, %v475_v23  ;;  %v322_v59 = vsel %vm320_vm11, %v1867_v37, 0.0  ;;  %vm1385_vm7 = vcmask 523264  }
0x1163   :  { %v772_v36 = vpop.permute.xlu1 %771 }
0x1164   :  { %vm776_vm14 = vcmp.eq.s32.totalorder %v772_v36, 1 }
0x116b   :  { %v921_v46 = vpop.permute.xlu1 %920 }
0x116c   :  { %vm923_vm3 = vcmp.eq.s32.totalorder %v921_v46, 1 }
0x117b   :  { %v1333_v30 = vpop.permute.xlu2 %1332 }
0x117c   :  { %v1337_v31 = vadd.f32 %v1333_v30, %v1317_v27 }
0x117e   :  { %1630 = vtanh.f32 %v1337_v31 }
0x1183   :  { %v468_v29 = vpop.permute.xlu2 %467 }
0x1184   :  { %v1631_v32 = vpop.eup %1630  ;;  %vm472_vm12 = vcmp.eq.s32.totalorder %v468_v29, 1 }
0x1185   :  { %1344 = vrot.lane.b32.xlu1 %v1631_v32, %s1659_s1  ;;  %v474_v1 = vsel %vm472_vm12, %v1903_v28, %v322_v59 }
0x118b   :  { %v620_v42 = vpop.permute.xlu2 %619 }
0x118c   :  { %vm624_vm13 = vcmp.eq.s32.totalorder %v620_v42, 1 }
0x118d   :  { %v626_v49 = vsel %vm624_vm13, %v1939_v39, %v474_v1 }
0x118e   :  { %v778_v53 = vsel %vm776_vm14, %v1975_v34, %v626_v49 }
0x118f   :  { %v924_v54 = vsel %vm922_vm15, %v2009_v50, %v778_v53 }
0x1193   :  { %v775_v35 = vpop.permute.xlu2 %774 }
0x1194   :  { %vm777_vm10 = vcmp.eq.s32.totalorder %v775_v35, 1 }
0x1195   :  { %v779_v41 = vsel %vm777_vm10, %v1979_v60, %v627_v26  ;;  %v1210_v60 = vpop.permute.xlu1 %1209 }
0x1196   :  { %vm1214_vm1 = vcmp.eq.s32.totalorder %v1210_v60, 1  ;;  %v925_v34 = vsel %vm923_vm3, %v2013_v13, %v779_v41  ;;  %v1379_v13 = vld [vmem:[%s2197_s5 + $0x30] sm:$0xff] }
0x119b   :  { %v1064_v51 = vpop.permute.xlu2 %1063 }
0x119c   :  { %vm1068_vm0 = vcmp.eq.s32.totalorder %v1064_v51, 1 }
0x119d   :  { %v1070_v58 = vsel %vm1068_vm0, %v2038_v57, %v924_v54  ;;  %v1071_v57 = vsel %vm1069_vm4, %v2042_v0, %v925_v34  ;;  %v1378_v0 = vld [vmem:[%s2197_s5 + $0x28] sm:$0xff] }
0x119e   :  { %v1216_v28 = vsel %vm1214_vm1, %v2067_v55, %v1070_v58  ;;  %v1380_v55 = vld [vmem:[%s2197_s5 + $0x38] sm:$0xff] }
0x119f   :  { %1397 = vmatpush.msrb.mxu0 %v1380_v55 }
0x11a1   :  { %1398 = vmatpush.msrb.mxu0 %v1379_v13 }
0x11a3   :  { %v1213_v48 = vpop.permute.xlu2 %1212  ;;  %1399 = vmatpush.msrb.mxu0 %v1378_v0 }
0x11a4   :  { %vm1215_vm5 = vcmp.eq.s32.totalorder %v1213_v48, 1 }
0x11a5   :  { %v1217_v14 = vsel %vm1215_vm5, %v2071_v6, %v1071_v57  ;;  %v1377_v6 = vld [vmem:[%s2197_s5 + $0x20] sm:$0xff] }
0x11a6   :  { %1400 = vmatpush.msrb.mxu0 %v1377_v6 }
0x11a8   :  { %1401 = vmatpush.msrb.mxu0 %v1376_v63 }
0x11aa   :  { %1402 = vmatpush.msrb.mxu0 %v1375_v2 }
0x11ab   :  { %v1356_v47 = vpop.permute.xlu2 %1355 }
0x11ac   :  { %vm1360_vm2 = vcmp.eq.s32.totalorder %v1356_v47, 1  ;;  %1403 = vmatpush.msrb.mxu0 %v1374_v44 }
0x11ae   :  { %1404 = vmatpush.msrb.mxu0 %v1373_v4 }
0x11c7   :  { %v1343_v9 = vpop.permute.xlu0 %1342 }
0x11c8   :  { %v1348_v37 = vmul.f32 %v1343_v9, %v2103_v43 }
0x11ca   :  { %v1362_v39 = vsel %vm1360_vm2, %v1348_v37, %v1216_v28 }
0x11cb   :  { %1365 = vrot.lane.b32.xlu1 %v1362_v39, %s1660_s4 }
0x11cf   :  { %v1359_v10 = vpop.permute.xlu0 %1358 }
0x11d0   :  { %vm1361_vm6 = vcmp.eq.s32.totalorder %v1359_v10, 1 }
0x11f7   :  { %v1345_v50 = vpop.permute.xlu1 %1344 }
0x11f8   :  { %v1349_v8 = vmul.f32 %v1345_v50, %v2119_v12  ;;  %v1503_v12 = vld [vmem:[%s2198_s6] ss:$0 sm:$0xff] }
0x11fa   :  { %v1363_v43 = vsel %vm1361_vm6, %v1349_v8, %v1217_v14 }
0x11fb   :  { %1369 = vrot.lane.b32.xlu2 %v1363_v43, %s1659_s1  ;;  %s1418_s1 = sshll.u32 %s2199_s7, 4  ;;  %s1419_s1 = int_to_ptr.hbm [resolvable:$true] %s1418_s1 }
0x123d   :  { %v1366_v56 = vpop.permute.xlu1 %1365 }
0x1255   :  { %v1370_v7 = vpop.permute.xlu2 %1369 }
0x1256   :  { %v1372_v11 = vsel %vm186_vm9, %v1366_v56, %v1370_v7 }
0x1257   :  { %1494 = vmatmul.msk.f32.vlgmr.msrb.gmra.mxu0 %vm1385_vm7, %v1372_v11 }
0x12d4   :  { %v1406_v15 = vpop.f32.mrf.mxu0 }
0x12d5   :  { %v1407_v40 = vadd.f32 %v1503_v12, %v1406_v15 }
0x12d7   :  { %1410 = vst.msk [vmem:[#allocation3] sm:$0xff] %vm1409_vm8, %v1407_v40 }
0x12d8   :  { %1421 = dma.vmem_to_hbm [thread:$0]  %s1417_s15, 128, %s1419_s1, [#allocation4]  }
0x12d9   :  { %1656 = dma.done.wait [#allocation4], 128  }
0x12da   :  { %1657 = vsyncadd [#allocation4], 4294967168 }
0x12db   :  { %1426 = vsyncpa [#allocation4], 1 }

</bundles_post_ra>
